<compile_context>
chip_gen: v6e
topology: v6e:2x2x1
jax: 0.10.0
libtpu: 0.0.40
codegen_flags: <defaults>
</compile_context>

<pallas_src>
import jax
import jax.numpy as jnp
from jax.experimental import pallas as pl
from jax.experimental.pallas import tpu as pltpu


ACT_DTYPE = jnp.bfloat16   # storage dtype for weights + inter-layer activations


def _round_up(x, m):
    return (x + m - 1) // m * m


def _make_block_kernel(H, W, c_in, c_out, G, GT, has_skip_conv):
    HW = H * W
    TAIL = GT - G - HW

    def kernel(*refs):
        if has_skip_conv:
            (xg_ref, w1_ref, b1_ref, w2_ref, b2_ref, w3_ref, b3_ref, ws_ref,
             o_ref, pad1, pad2) = refs
        else:
            (xg_ref, w1_ref, b1_ref, w2_ref, b2_ref, w3_ref, b3_ref,
             o_ref, pad1, pad2) = refs
            ws_ref = None

        # Guard zeros for the persistent stash scratch (lane-aligned full-vreg stores).
        zhead = jnp.zeros((c_out, G), ACT_DTYPE)
        ztail = jnp.zeros((c_out, TAIL), ACT_DTYPE)
        pad1[:, 0:G] = zhead
        pad1[:, G + HW:GT] = ztail
        pad2[:, 0:G] = zhead
        pad2[:, G + HW:GT] = ztail

        def conv3x3(src_ref, c, w_ref, b_ref):
            # Column-validity masks: kill the row-wrap contamination of the kx = -1 / +1 taps
            # (out-of-image rows are handled by the guard zeros).
            col = jax.lax.broadcasted_iota(jnp.int32, (c, HW), 1) % W
            not_left = col != 0          # kx = -1 is invalid at output column 0
            not_right = col != (W - 1)   # kx = +1 is invalid at output column W-1
            zero = jnp.zeros((c, HW), ACT_DTYPE)

            acc = None
            for ky in range(3):
                for kx in range(3):
                    off = G + (ky - 1) * W + (kx - 1)        # static lane offset
                    s = src_ref[:, pl.ds(off, HW)]           # (c, HW) bf16, lane-dense
                    if kx == 0:
                        s = jnp.where(not_left, s, zero)
                    elif kx == 2:
                        s = jnp.where(not_right, s, zero)
                    p = jnp.dot(w_ref[ky * 3 + kx], s,       # (Cout,c)@(c,HW) -> f32 acc
                                preferred_element_type=jnp.float32)
                    acc = p if acc is None else acc + p
            return acc + b_ref[...]                          # (Cout, HW) f32

        def stash(dst_ref, act_f32):
            # interior is fully overwritten; guards were zeroed above
            dst_ref[:, G:G + HW] = act_f32.astype(ACT_DTYPE)

        a1 = jnp.maximum(conv3x3(xg_ref, c_in, w1_ref, b1_ref), 0.0)
        stash(pad1, a1)
        a2 = jnp.maximum(conv3x3(pad1, c_out, w2_ref, b2_ref), 0.0)
        stash(pad2, a2)
        a3 = conv3x3(pad2, c_out, w3_ref, b3_ref)

        # skip path: input sampled at the output pixel positions
        x_center = xg_ref[:, pl.ds(G, HW)]                   # (c_in, HW) bf16
        if has_skip_conv:
            skip = jnp.dot(ws_ref[...], x_center, preferred_element_type=jnp.float32)
        else:
            skip = x_center.astype(jnp.float32)              # nn.Identity(): c_in == c_out

        o_ref[...] = jnp.maximum(a3 + skip, 0.0)

    return kernel


def taesd_block_forward(x_nchw, kp):
    B, Cin, H, W = x_nchw.shape
    Cout = kp["b1"].shape[0]
    has_skip_conv = "ws" in kp
    if not has_skip_conv:
        assert Cin == Cout, "identity skip requires n_in == n_out"

    HW = H * W
    G = _round_up(W + 1, 128)                  # head guard, lane-aligned so stashes are unmasked
    GT = _round_up(G + HW + W + 1, 128)        # guarded flattened spatial extent

    kernel = _make_block_kernel(H, W, Cin, Cout, G, GT, has_skip_conv)

    # glue: NCHW is already channel-major -> flatten spatial (free) + one guard pad + bf16 cast
    xg = jnp.pad(x_nchw.reshape(B, Cin, HW),
                 ((0, 0), (0, 0), (G, GT - G - HW))).astype(ACT_DTYPE)

    in_specs = [
        pl.BlockSpec((None, Cin, GT), lambda b: (b, 0, 0)),     # guarded input (bf16)
        pl.BlockSpec((9, Cout, Cin), lambda b: (0, 0, 0)),      # w1 taps
        pl.BlockSpec((Cout, 1), lambda b: (0, 0)),              # b1
        pl.BlockSpec((9, Cout, Cout), lambda b: (0, 0, 0)),     # w2 taps
        pl.BlockSpec((Cout, 1), lambda b: (0, 0)),              # b2
        pl.BlockSpec((9, Cout, Cout), lambda b: (0, 0, 0)),     # w3 taps
        pl.BlockSpec((Cout, 1), lambda b: (0, 0)),              # b3
    ]
    args = [xg, kp["w1"], kp["b1"], kp["w2"], kp["b2"], kp["w3"], kp["b3"]]
    if has_skip_conv:
        in_specs.append(pl.BlockSpec((Cout, Cin), lambda b: (0, 0)))   # skip 1x1 weight
        args.append(kp["ws"])

    # VMEM budget derived from the actual buffers (double-buffered in/out, weights, scratch).
    w_elems = 9 * Cout * Cin + 18 * Cout * Cout + (Cin * Cout if has_skip_conv else 0)
    need = (2 * Cin * GT * 2            # input block x2 pipeline buffers (bf16)
            + 2 * Cout * HW * 4         # output block x2 (f32)
            + 2 * w_elems * 2           # weights x2 (bf16)
            + 2 * 3 * Cout * 4          # biases x2 (f32)
            + 2 * Cout * GT * 2)        # pad1/pad2 scratch (bf16)
    vmem_limit = min(max(4 * need, 16 * 1024 * 1024), 100 * 1024 * 1024)

    out = pl.pallas_call(
        kernel,
        out_shape=jax.ShapeDtypeStruct((B, Cout, HW), jnp.float32),
        grid_spec=pltpu.PrefetchScalarGridSpec(
            num_scalar_prefetch=0,
            grid=(B,),
            in_specs=in_specs,
            out_specs=pl.BlockSpec((None, Cout, HW), lambda b: (b, 0, 0)),
            scratch_shapes=[
                pltpu.VMEM((Cout, GT), ACT_DTYPE),   # layer-1 activation (guarded)
                pltpu.VMEM((Cout, GT), ACT_DTYPE),   # layer-2 activation (guarded)
            ],
        ),
        compiler_params=pltpu.CompilerParams(
            dimension_semantics=("parallel",),
            vmem_limit_bytes=vmem_limit,
        ),
    )(*args)

    return out.reshape(B, Cout, H, W)                 # already NCHW-ordered, no transpose


def init_params(key, n_in, n_out):
    ks = jax.random.split(key, 7)
    W1 = jax.random.normal(ks[0], (n_out, n_in, 3, 3), jnp.float32) * 0.1
    b1 = jax.random.normal(ks[1], (n_out,), jnp.float32) * 0.1
    W2 = jax.random.normal(ks[2], (n_out, n_out, 3, 3), jnp.float32) * 0.1
    b2 = jax.random.normal(ks[3], (n_out,), jnp.float32) * 0.1
    W3 = jax.random.normal(ks[4], (n_out, n_out, 3, 3), jnp.float32) * 0.1
    b3 = jax.random.normal(ks[5], (n_out,), jnp.float32) * 0.1
    if n_in != n_out:
        WS = jax.random.normal(ks[6], (n_out, n_in, 1, 1), jnp.float32) * 0.1
    else:
        WS = jnp.eye(n_out, dtype=jnp.float32)[:, :, None, None]   # == nn.Identity()

    torch_p = dict(W1=W1, b1=b1, W2=W2, b2=b2, W3=W3, b3=b3, WS=WS)

    def taps(Wc):   # OIHW (Co,Ci,3,3) -> (9, Co, Ci) with tap index t = ky*3 + kx, bf16
        Co, Ci = Wc.shape[0], Wc.shape[1]
        return jnp.transpose(Wc, (2, 3, 0, 1)).reshape(9, Co, Ci).astype(ACT_DTYPE)

    kernel_p = dict(
        w1=taps(W1), b1=b1.reshape(n_out, 1),
        w2=taps(W2), b2=b2.reshape(n_out, 1),
        w3=taps(W3), b3=b3.reshape(n_out, 1),
    )
    if n_in != n_out:
        kernel_p["ws"] = WS[:, :, 0, 0].astype(ACT_DTYPE)   # (Cout, Cin)
    return torch_p, kernel_p


def reference_block(x, p):
    def conv(x, w, b=None, pad=1):
        y = jax.lax.conv_general_dilated(
            x, w, (1, 1), [(pad, pad), (pad, pad)],
            dimension_numbers=("NCHW", "OIHW", "NCHW"))
        if b is not None:
            y = y + b[None, :, None, None]
        return y
    h = jax.nn.relu(conv(x, p["W1"], p["b1"]))
    h = jax.nn.relu(conv(h, p["W2"], p["b2"]))
    h = conv(h, p["W3"], p["b3"])
    s = conv(x, p["WS"], None, pad=0)
    return jax.nn.relu(h + s)


if __name__ == "__main__":
    key = jax.random.PRNGKey(0)
    k_x, k_p1, k_p2 = jax.random.split(key, 3)

    # bf16 weight/activation storage with f32 accumulation -> slightly looser tolerance than pure f32
    ATOL = RTOL = 2e-2

    # Case 1: n_in != n_out  -> 1x1-conv skip path
    B, n_in, n_out, H, W = 2, 8, 16, 16, 16
    x = jax.random.normal(k_x, (B, n_in, H, W), jnp.float32)
    torch_p, kernel_p = init_params(k_p1, n_in, n_out)
    out = jax.block_until_ready(taesd_block_forward(x, kernel_p))
    ref = reference_block(x, torch_p)
    assert out.shape == (B, n_out, H, W)
    assert jnp.allclose(out, ref, atol=ATOL, rtol=RTOL), float(jnp.max(jnp.abs(out - ref)))

    # Case 2: n_in == n_out  -> identity skip (no skip matmul / ws DMA in kernel)
    x2 = jax.random.normal(k_x, (B, n_out, H, W), jnp.float32)
    torch_p2, kernel_p2 = init_params(k_p2, n_out, n_out)
    out2 = jax.block_until_ready(taesd_block_forward(x2, kernel_p2))
    ref2 = reference_block(x2, torch_p2)
    assert out2.shape == (B, n_out, H, W)
    assert jnp.allclose(out2, ref2, atol=ATOL, rtol=RTOL), float(jnp.max(jnp.abs(out2 - ref2)))

    print("KERNEL_OK")
</pallas_src>

<mosaic_0001>
module attributes {stable_mosaic.version = 11 : i64} {
  func.func @kernel(%arg0: i32, %arg1: memref<1x8x512xbf16, #tpu.memory_space<vmem>>, %arg2: memref<9x16x8xbf16, #tpu.memory_space<vmem>>, %arg3: memref<16x1xf32, #tpu.memory_space<vmem>>, %arg4: memref<9x16x16xbf16, #tpu.memory_space<vmem>>, %arg5: memref<16x1xf32, #tpu.memory_space<vmem>>, %arg6: memref<9x16x16xbf16, #tpu.memory_space<vmem>>, %arg7: memref<16x1xf32, #tpu.memory_space<vmem>>, %arg8: memref<16x8xbf16, #tpu.memory_space<vmem>>, %arg9: memref<1x16x256xf32, #tpu.memory_space<vmem>>, %arg10: memref<16x512xbf16, #tpu.memory_space<vmem>>, %arg11: memref<16x512xbf16, #tpu.memory_space<vmem>>) attributes {dimension_semantics = [#tpu.dimension_semantics<parallel>], iteration_bounds = array<i64: 2>, scalar_prefetch = 0 : i64, scratch_operands = 2 : i64, tpu.core_type = #tpu.core_type<tc>, window_params = [{transform_indices = @transform_0, window_bounds = array<i64: 1, 8, 512>}, {pipeline_mode = #tpu.pipeline_mode<synchronous>, transform_indices = @transform_1, window_bounds = array<i64: 9, 16, 8>}, {pipeline_mode = #tpu.pipeline_mode<synchronous>, transform_indices = @transform_2, window_bounds = array<i64: 16, 1>}, {pipeline_mode = #tpu.pipeline_mode<synchronous>, transform_indices = @transform_3, window_bounds = array<i64: 9, 16, 16>}, {pipeline_mode = #tpu.pipeline_mode<synchronous>, transform_indices = @transform_4, window_bounds = array<i64: 16, 1>}, {pipeline_mode = #tpu.pipeline_mode<synchronous>, transform_indices = @transform_5, window_bounds = array<i64: 9, 16, 16>}, {pipeline_mode = #tpu.pipeline_mode<synchronous>, transform_indices = @transform_6, window_bounds = array<i64: 16, 1>}, {pipeline_mode = #tpu.pipeline_mode<synchronous>, transform_indices = @transform_7, window_bounds = array<i64: 16, 8>}, {transform_indices = @transform_8, window_bounds = array<i64: 1, 16, 256>}]} {
    %cst = arith.constant 0.000000e+00 : bf16
    %0 = vector.broadcast %cst : bf16 to vector<16x128xbf16>
    %cst_0 = arith.constant 0.000000e+00 : bf16
    %1 = vector.broadcast %cst_0 : bf16 to vector<16x128xbf16>
    %c0 = arith.constant 0 : index
    %c0_1 = arith.constant 0 : index
    %2 = vector.load %arg10[%c0, %c0_1] : memref<16x512xbf16, #tpu.memory_space<vmem>>, vector<16x128xbf16>
    tpu.vector_store %arg10[%c0, %c0_1], %0 {strides = array<i32>} : memref<16x512xbf16, #tpu.memory_space<vmem>>, vector<16x128xbf16>,
    %c0_2 = arith.constant 0 : index
    %c384 = arith.constant 384 : index
    %3 = vector.load %arg10[%c0_2, %c384] : memref<16x512xbf16, #tpu.memory_space<vmem>>, vector<16x128xbf16>
    tpu.vector_store %arg10[%c0_2, %c384], %1 {strides = array<i32>} : memref<16x512xbf16, #tpu.memory_space<vmem>>, vector<16x128xbf16>,
    %c0_3 = arith.constant 0 : index
    %c0_4 = arith.constant 0 : index
    %4 = vector.load %arg11[%c0_3, %c0_4] : memref<16x512xbf16, #tpu.memory_space<vmem>>, vector<16x128xbf16>
    tpu.vector_store %arg11[%c0_3, %c0_4], %0 {strides = array<i32>} : memref<16x512xbf16, #tpu.memory_space<vmem>>, vector<16x128xbf16>,
    %c0_5 = arith.constant 0 : index
    %c384_6 = arith.constant 384 : index
    %5 = vector.load %arg11[%c0_5, %c384_6] : memref<16x512xbf16, #tpu.memory_space<vmem>>, vector<16x128xbf16>
    tpu.vector_store %arg11[%c0_5, %c384_6], %1 {strides = array<i32>} : memref<16x512xbf16, #tpu.memory_space<vmem>>, vector<16x128xbf16>,
    %6 = tpu.iota {dimensions = array<i32: 1>} : vector<8x256xi32>
    %c16_i32 = arith.constant 16 : i32
    %c0_i32 = arith.constant 0 : i32
    %7 = arith.cmpi eq, %c16_i32, %c0_i32 : i32
    %c1_i32 = arith.constant 1 : i32
    %8 = arith.select %7, %c1_i32, %c16_i32 : i32
    %9 = vector.broadcast %8 : i32 to vector<8x256xi32>
    %10 = arith.remsi %6, %9 : vector<8x256xi32>
    %c0_i32_7 = arith.constant 0 : i32
    %11 = vector.broadcast %c0_i32_7 : i32 to vector<8x256xi32>
    %12 = arith.cmpi ne, %10, %11 : vector<8x256xi32>
    %c0_i32_8 = arith.constant 0 : i32
    %13 = vector.broadcast %c0_i32_8 : i32 to vector<8x256xi32>
    %14 = arith.cmpi slt, %10, %13 : vector<8x256xi32>
    %c0_i32_9 = arith.constant 0 : i32
    %15 = arith.cmpi slt, %8, %c0_i32_9 : i32
    %16 = vector.broadcast %15 : i1 to vector<8x256xi1>
    %17 = vector.broadcast %16 : vector<8x256xi1> to vector<8x256xi1>
    %18 = arith.xori %14, %17 : vector<8x256xi1>
    %19 = arith.andi %18, %12 : vector<8x256xi1>
    %20 = vector.broadcast %8 : i32 to vector<8x256xi32>
    %21 = arith.addi %10, %20 : vector<8x256xi32>
    %22 = arith.select %19, %21, %10 : vector<8x256xi1>, vector<8x256xi32>
    %c0_i32_10 = arith.constant 0 : i32
    %23 = vector.broadcast %c0_i32_10 : i32 to vector<8x256xi32>
    %24 = arith.cmpi ne, %22, %23 : vector<8x256xi32>
    %c15_i32 = arith.constant 15 : i32
    %25 = vector.broadcast %c15_i32 : i32 to vector<8x256xi32>
    %26 = arith.cmpi ne, %22, %25 : vector<8x256xi32>
    %cst_11 = arith.constant 0.000000e+00 : bf16
    %27 = vector.broadcast %cst_11 : bf16 to vector<8x256xbf16>
    %c0_12 = arith.constant 0 : index
    %c0_13 = arith.constant 0 : index
    %c111 = arith.constant 111 : index
    %28 = vector.load %arg1[%c0_12, %c0_13, %c111] : memref<1x8x512xbf16, #tpu.memory_space<vmem>>, vector<1x8x256xbf16>
    %29 = vector.shape_cast %28 : vector<1x8x256xbf16> to vector<8x256xbf16>
    %30 = arith.select %24, %29, %27 : vector<8x256xi1>, vector<8x256xbf16>
    %c0_14 = arith.constant 0 : index
    %c0_15 = arith.constant 0 : index
    %c0_16 = arith.constant 0 : index
    %31 = vector.load %arg2[%c0_14, %c0_15, %c0_16] : memref<9x16x8xbf16, #tpu.memory_space<vmem>>, vector<1x16x8xbf16>
    %32 = vector.shape_cast %31 : vector<1x16x8xbf16> to vector<16x8xbf16>
    %cst_17 = arith.constant dense<0.000000e+00> : vector<16x256xf32>
    %33 = tpu.matmul %32, %30, %cst_17 {dimension_numbers = #tpu.dot_dimension_numbers<[1], [0], [0], [1], [0, 0, 1, 1], [], []>} : vector<16x8xbf16>, vector<8x256xbf16>, vector<16x256xf32> -> vector<16x256xf32>
    %c0_18 = arith.constant 0 : index
    %c0_19 = arith.constant 0 : index
    %c112 = arith.constant 112 : index
    %34 = vector.load %arg1[%c0_18, %c0_19, %c112] : memref<1x8x512xbf16, #tpu.memory_space<vmem>>, vector<1x8x256xbf16>
    %35 = vector.shape_cast %34 : vector<1x8x256xbf16> to vector<8x256xbf16>
    %c1 = arith.constant 1 : index
    %c0_20 = arith.constant 0 : index
    %c0_21 = arith.constant 0 : index
    %36 = vector.load %arg2[%c1, %c0_20, %c0_21] : memref<9x16x8xbf16, #tpu.memory_space<vmem>>, vector<1x16x8xbf16>
    %37 = vector.shape_cast %36 : vector<1x16x8xbf16> to vector<16x8xbf16>
    %cst_22 = arith.constant dense<0.000000e+00> : vector<16x256xf32>
    %38 = tpu.matmul %37, %35, %cst_22 {dimension_numbers = #tpu.dot_dimension_numbers<[1], [0], [0], [1], [0, 0, 1, 1], [], []>} : vector<16x8xbf16>, vector<8x256xbf16>, vector<16x256xf32> -> vector<16x256xf32>
    %39 = arith.addf %33, %38 : vector<16x256xf32>
    %c0_23 = arith.constant 0 : index
    %c0_24 = arith.constant 0 : index
    %c113 = arith.constant 113 : index
    %40 = vector.load %arg1[%c0_23, %c0_24, %c113] : memref<1x8x512xbf16, #tpu.memory_space<vmem>>, vector<1x8x256xbf16>
    %41 = vector.shape_cast %40 : vector<1x8x256xbf16> to vector<8x256xbf16>
    %42 = arith.select %26, %41, %27 : vector<8x256xi1>, vector<8x256xbf16>
    %c2 = arith.constant 2 : index
    %c0_25 = arith.constant 0 : index
    %c0_26 = arith.constant 0 : index
    %43 = vector.load %arg2[%c2, %c0_25, %c0_26] : memref<9x16x8xbf16, #tpu.memory_space<vmem>>, vector<1x16x8xbf16>
    %44 = vector.shape_cast %43 : vector<1x16x8xbf16> to vector<16x8xbf16>
    %cst_27 = arith.constant dense<0.000000e+00> : vector<16x256xf32>
    %45 = tpu.matmul %44, %42, %cst_27 {dimension_numbers = #tpu.dot_dimension_numbers<[1], [0], [0], [1], [0, 0, 1, 1], [], []>} : vector<16x8xbf16>, vector<8x256xbf16>, vector<16x256xf32> -> vector<16x256xf32>
    %46 = arith.addf %39, %45 : vector<16x256xf32>
    %c0_28 = arith.constant 0 : index
    %c0_29 = arith.constant 0 : index
    %c127 = arith.constant 127 : index
    %47 = vector.load %arg1[%c0_28, %c0_29, %c127] : memref<1x8x512xbf16, #tpu.memory_space<vmem>>, vector<1x8x256xbf16>
    %48 = vector.shape_cast %47 : vector<1x8x256xbf16> to vector<8x256xbf16>
    %49 = arith.select %24, %48, %27 : vector<8x256xi1>, vector<8x256xbf16>
    %c3 = arith.constant 3 : index
    %c0_30 = arith.constant 0 : index
    %c0_31 = arith.constant 0 : index
    %50 = vector.load %arg2[%c3, %c0_30, %c0_31] : memref<9x16x8xbf16, #tpu.memory_space<vmem>>, vector<1x16x8xbf16>
    %51 = vector.shape_cast %50 : vector<1x16x8xbf16> to vector<16x8xbf16>
    %cst_32 = arith.constant dense<0.000000e+00> : vector<16x256xf32>
    %52 = tpu.matmul %51, %49, %cst_32 {dimension_numbers = #tpu.dot_dimension_numbers<[1], [0], [0], [1], [0, 0, 1, 1], [], []>} : vector<16x8xbf16>, vector<8x256xbf16>, vector<16x256xf32> -> vector<16x256xf32>
    %53 = arith.addf %46, %52 : vector<16x256xf32>
    %c0_33 = arith.constant 0 : index
    %c0_34 = arith.constant 0 : index
    %c128 = arith.constant 128 : index
    %54 = vector.load %arg1[%c0_33, %c0_34, %c128] : memref<1x8x512xbf16, #tpu.memory_space<vmem>>, vector<1x8x256xbf16>
    %55 = vector.shape_cast %54 : vector<1x8x256xbf16> to vector<8x256xbf16>
    %c4 = arith.constant 4 : index
    %c0_35 = arith.constant 0 : index
    %c0_36 = arith.constant 0 : index
    %56 = vector.load %arg2[%c4, %c0_35, %c0_36] : memref<9x16x8xbf16, #tpu.memory_space<vmem>>, vector<1x16x8xbf16>
    %57 = vector.shape_cast %56 : vector<1x16x8xbf16> to vector<16x8xbf16>
    %cst_37 = arith.constant dense<0.000000e+00> : vector<16x256xf32>
    %58 = tpu.matmul %57, %55, %cst_37 {dimension_numbers = #tpu.dot_dimension_numbers<[1], [0], [0], [1], [0, 0, 1, 1], [], []>} : vector<16x8xbf16>, vector<8x256xbf16>, vector<16x256xf32> -> vector<16x256xf32>
    %59 = arith.addf %53, %58 : vector<16x256xf32>
    %c0_38 = arith.constant 0 : index
    %c0_39 = arith.constant 0 : index
    %c129 = arith.constant 129 : index
    %60 = vector.load %arg1[%c0_38, %c0_39, %c129] : memref<1x8x512xbf16, #tpu.memory_space<vmem>>, vector<1x8x256xbf16>
    %61 = vector.shape_cast %60 : vector<1x8x256xbf16> to vector<8x256xbf16>
    %62 = arith.select %26, %61, %27 : vector<8x256xi1>, vector<8x256xbf16>
    %c5 = arith.constant 5 : index
    %c0_40 = arith.constant 0 : index
    %c0_41 = arith.constant 0 : index
    %63 = vector.load %arg2[%c5, %c0_40, %c0_41] : memref<9x16x8xbf16, #tpu.memory_space<vmem>>, vector<1x16x8xbf16>
    %64 = vector.shape_cast %63 : vector<1x16x8xbf16> to vector<16x8xbf16>
    %cst_42 = arith.constant dense<0.000000e+00> : vector<16x256xf32>
    %65 = tpu.matmul %64, %62, %cst_42 {dimension_numbers = #tpu.dot_dimension_numbers<[1], [0], [0], [1], [0, 0, 1, 1], [], []>} : vector<16x8xbf16>, vector<8x256xbf16>, vector<16x256xf32> -> vector<16x256xf32>
    %66 = arith.addf %59, %65 : vector<16x256xf32>
    %c0_43 = arith.constant 0 : index
    %c0_44 = arith.constant 0 : index
    %c143 = arith.constant 143 : index
    %67 = vector.load %arg1[%c0_43, %c0_44, %c143] : memref<1x8x512xbf16, #tpu.memory_space<vmem>>, vector<1x8x256xbf16>
    %68 = vector.shape_cast %67 : vector<1x8x256xbf16> to vector<8x256xbf16>
    %69 = arith.select %24, %68, %27 : vector<8x256xi1>, vector<8x256xbf16>
    %c6 = arith.constant 6 : index
    %c0_45 = arith.constant 0 : index
    %c0_46 = arith.constant 0 : index
    %70 = vector.load %arg2[%c6, %c0_45, %c0_46] : memref<9x16x8xbf16, #tpu.memory_space<vmem>>, vector<1x16x8xbf16>
    %71 = vector.shape_cast %70 : vector<1x16x8xbf16> to vector<16x8xbf16>
    %cst_47 = arith.constant dense<0.000000e+00> : vector<16x256xf32>
    %72 = tpu.matmul %71, %69, %cst_47 {dimension_numbers = #tpu.dot_dimension_numbers<[1], [0], [0], [1], [0, 0, 1, 1], [], []>} : vector<16x8xbf16>, vector<8x256xbf16>, vector<16x256xf32> -> vector<16x256xf32>
    %73 = arith.addf %66, %72 : vector<16x256xf32>
    %c0_48 = arith.constant 0 : index
    %c0_49 = arith.constant 0 : index
    %c144 = arith.constant 144 : index
    %74 = vector.load %arg1[%c0_48, %c0_49, %c144] : memref<1x8x512xbf16, #tpu.memory_space<vmem>>, vector<1x8x256xbf16>
    %75 = vector.shape_cast %74 : vector<1x8x256xbf16> to vector<8x256xbf16>
    %c7 = arith.constant 7 : index
    %c0_50 = arith.constant 0 : index
    %c0_51 = arith.constant 0 : index
    %76 = vector.load %arg2[%c7, %c0_50, %c0_51] : memref<9x16x8xbf16, #tpu.memory_space<vmem>>, vector<1x16x8xbf16>
    %77 = vector.shape_cast %76 : vector<1x16x8xbf16> to vector<16x8xbf16>
    %cst_52 = arith.constant dense<0.000000e+00> : vector<16x256xf32>
    %78 = tpu.matmul %77, %75, %cst_52 {dimension_numbers = #tpu.dot_dimension_numbers<[1], [0], [0], [1], [0, 0, 1, 1], [], []>} : vector<16x8xbf16>, vector<8x256xbf16>, vector<16x256xf32> -> vector<16x256xf32>
    %79 = arith.addf %73, %78 : vector<16x256xf32>
    %c0_53 = arith.constant 0 : index
    %c0_54 = arith.constant 0 : index
    %c145 = arith.constant 145 : index
    %80 = vector.load %arg1[%c0_53, %c0_54, %c145] : memref<1x8x512xbf16, #tpu.memory_space<vmem>>, vector<1x8x256xbf16>
    %81 = vector.shape_cast %80 : vector<1x8x256xbf16> to vector<8x256xbf16>
    %82 = arith.select %26, %81, %27 : vector<8x256xi1>, vector<8x256xbf16>
    %c8 = arith.constant 8 : index
    %c0_55 = arith.constant 0 : index
    %c0_56 = arith.constant 0 : index
    %83 = vector.load %arg2[%c8, %c0_55, %c0_56] : memref<9x16x8xbf16, #tpu.memory_space<vmem>>, vector<1x16x8xbf16>
    %84 = vector.shape_cast %83 : vector<1x16x8xbf16> to vector<16x8xbf16>
    %cst_57 = arith.constant dense<0.000000e+00> : vector<16x256xf32>
    %85 = tpu.matmul %84, %82, %cst_57 {dimension_numbers = #tpu.dot_dimension_numbers<[1], [0], [0], [1], [0, 0, 1, 1], [], []>} : vector<16x8xbf16>, vector<8x256xbf16>, vector<16x256xf32> -> vector<16x256xf32>
    %86 = arith.addf %79, %85 : vector<16x256xf32>
    %c0_58 = arith.constant 0 : index
    %c0_59 = arith.constant 0 : index
    %87 = vector.load %arg3[%c0_58, %c0_59] : memref<16x1xf32, #tpu.memory_space<vmem>>, vector<16x1xf32>
    %88 = vector.broadcast %87 : vector<16x1xf32> to vector<16x256xf32>
    %89 = arith.addf %86, %88 : vector<16x256xf32>
    %cst_60 = arith.constant 0.000000e+00 : f32
    %90 = vector.broadcast %cst_60 : f32 to vector<16x256xf32>
    %91 = arith.maximumf %89, %90 : vector<16x256xf32>
    %92 = arith.truncf %91 : vector<16x256xf32> to vector<16x256xbf16>
    %c0_61 = arith.constant 0 : index
    %c128_62 = arith.constant 128 : index
    %93 = vector.load %arg10[%c0_61, %c128_62] : memref<16x512xbf16, #tpu.memory_space<vmem>>, vector<16x256xbf16>
    tpu.vector_store %arg10[%c0_61, %c128_62], %92 {strides = array<i32>} : memref<16x512xbf16, #tpu.memory_space<vmem>>, vector<16x256xbf16>,
    %94 = tpu.iota {dimensions = array<i32: 1>} : vector<16x256xi32>
    %c16_i32_63 = arith.constant 16 : i32
    %c0_i32_64 = arith.constant 0 : i32
    %95 = arith.cmpi eq, %c16_i32_63, %c0_i32_64 : i32
    %c1_i32_65 = arith.constant 1 : i32
    %96 = arith.select %95, %c1_i32_65, %c16_i32_63 : i32
    %97 = vector.broadcast %96 : i32 to vector<16x256xi32>
    %98 = arith.remsi %94, %97 : vector<16x256xi32>
    %c0_i32_66 = arith.constant 0 : i32
    %99 = vector.broadcast %c0_i32_66 : i32 to vector<16x256xi32>
    %100 = arith.cmpi ne, %98, %99 : vector<16x256xi32>
    %c0_i32_67 = arith.constant 0 : i32
    %101 = vector.broadcast %c0_i32_67 : i32 to vector<16x256xi32>
    %102 = arith.cmpi slt, %98, %101 : vector<16x256xi32>
    %c0_i32_68 = arith.constant 0 : i32
    %103 = arith.cmpi slt, %96, %c0_i32_68 : i32
    %104 = vector.broadcast %103 : i1 to vector<16x256xi1>
    %105 = vector.broadcast %104 : vector<16x256xi1> to vector<16x256xi1>
    %106 = arith.xori %102, %105 : vector<16x256xi1>
    %107 = arith.andi %106, %100 : vector<16x256xi1>
    %108 = vector.broadcast %96 : i32 to vector<16x256xi32>
    %109 = arith.addi %98, %108 : vector<16x256xi32>
    %110 = arith.select %107, %109, %98 : vector<16x256xi1>, vector<16x256xi32>
    %c0_i32_69 = arith.constant 0 : i32
    %111 = vector.broadcast %c0_i32_69 : i32 to vector<16x256xi32>
    %112 = arith.cmpi ne, %110, %111 : vector<16x256xi32>
    %c15_i32_70 = arith.constant 15 : i32
    %113 = vector.broadcast %c15_i32_70 : i32 to vector<16x256xi32>
    %114 = arith.cmpi ne, %110, %113 : vector<16x256xi32>
    %cst_71 = arith.constant 0.000000e+00 : bf16
    %115 = vector.broadcast %cst_71 : bf16 to vector<16x256xbf16>
    %c0_72 = arith.constant 0 : index
    %c111_73 = arith.constant 111 : index
    %116 = vector.load %arg10[%c0_72, %c111_73] : memref<16x512xbf16, #tpu.memory_space<vmem>>, vector<16x256xbf16>
    %117 = arith.select %112, %116, %115 : vector<16x256xi1>, vector<16x256xbf16>
    %c0_74 = arith.constant 0 : index
    %c0_75 = arith.constant 0 : index
    %c0_76 = arith.constant 0 : index
    %118 = vector.load %arg4[%c0_74, %c0_75, %c0_76] : memref<9x16x16xbf16, #tpu.memory_space<vmem>>, vector<1x16x16xbf16>
    %119 = vector.shape_cast %118 : vector<1x16x16xbf16> to vector<16x16xbf16>
    %cst_77 = arith.constant dense<0.000000e+00> : vector<16x256xf32>
    %120 = tpu.matmul %119, %117, %cst_77 {dimension_numbers = #tpu.dot_dimension_numbers<[1], [0], [0], [1], [0, 0, 1, 1], [], []>} : vector<16x16xbf16>, vector<16x256xbf16>, vector<16x256xf32> -> vector<16x256xf32>
    %c0_78 = arith.constant 0 : index
    %c112_79 = arith.constant 112 : index
    %121 = vector.load %arg10[%c0_78, %c112_79] : memref<16x512xbf16, #tpu.memory_space<vmem>>, vector<16x256xbf16>
    %c1_80 = arith.constant 1 : index
    %c0_81 = arith.constant 0 : index
    %c0_82 = arith.constant 0 : index
    %122 = vector.load %arg4[%c1_80, %c0_81, %c0_82] : memref<9x16x16xbf16, #tpu.memory_space<vmem>>, vector<1x16x16xbf16>
    %123 = vector.shape_cast %122 : vector<1x16x16xbf16> to vector<16x16xbf16>
    %cst_83 = arith.constant dense<0.000000e+00> : vector<16x256xf32>
    %124 = tpu.matmul %123, %121, %cst_83 {dimension_numbers = #tpu.dot_dimension_numbers<[1], [0], [0], [1], [0, 0, 1, 1], [], []>} : vector<16x16xbf16>, vector<16x256xbf16>, vector<16x256xf32> -> vector<16x256xf32>
    %125 = arith.addf %120, %124 : vector<16x256xf32>
    %c0_84 = arith.constant 0 : index
    %c113_85 = arith.constant 113 : index
    %126 = vector.load %arg10[%c0_84, %c113_85] : memref<16x512xbf16, #tpu.memory_space<vmem>>, vector<16x256xbf16>
    %127 = arith.select %114, %126, %115 : vector<16x256xi1>, vector<16x256xbf16>
    %c2_86 = arith.constant 2 : index
    %c0_87 = arith.constant 0 : index
    %c0_88 = arith.constant 0 : index
    %128 = vector.load %arg4[%c2_86, %c0_87, %c0_88] : memref<9x16x16xbf16, #tpu.memory_space<vmem>>, vector<1x16x16xbf16>
    %129 = vector.shape_cast %128 : vector<1x16x16xbf16> to vector<16x16xbf16>
    %cst_89 = arith.constant dense<0.000000e+00> : vector<16x256xf32>
    %130 = tpu.matmul %129, %127, %cst_89 {dimension_numbers = #tpu.dot_dimension_numbers<[1], [0], [0], [1], [0, 0, 1, 1], [], []>} : vector<16x16xbf16>, vector<16x256xbf16>, vector<16x256xf32> -> vector<16x256xf32>
    %131 = arith.addf %125, %130 : vector<16x256xf32>
    %c0_90 = arith.constant 0 : index
    %c127_91 = arith.constant 127 : index
    %132 = vector.load %arg10[%c0_90, %c127_91] : memref<16x512xbf16, #tpu.memory_space<vmem>>, vector<16x256xbf16>
    %133 = arith.select %112, %132, %115 : vector<16x256xi1>, vector<16x256xbf16>
    %c3_92 = arith.constant 3 : index
    %c0_93 = arith.constant 0 : index
    %c0_94 = arith.constant 0 : index
    %134 = vector.load %arg4[%c3_92, %c0_93, %c0_94] : memref<9x16x16xbf16, #tpu.memory_space<vmem>>, vector<1x16x16xbf16>
    %135 = vector.shape_cast %134 : vector<1x16x16xbf16> to vector<16x16xbf16>
    %cst_95 = arith.constant dense<0.000000e+00> : vector<16x256xf32>
    %136 = tpu.matmul %135, %133, %cst_95 {dimension_numbers = #tpu.dot_dimension_numbers<[1], [0], [0], [1], [0, 0, 1, 1], [], []>} : vector<16x16xbf16>, vector<16x256xbf16>, vector<16x256xf32> -> vector<16x256xf32>
    %137 = arith.addf %131, %136 : vector<16x256xf32>
    %c0_96 = arith.constant 0 : index
    %c128_97 = arith.constant 128 : index
    %138 = vector.load %arg10[%c0_96, %c128_97] : memref<16x512xbf16, #tpu.memory_space<vmem>>, vector<16x256xbf16>
    %c4_98 = arith.constant 4 : index
    %c0_99 = arith.constant 0 : index
    %c0_100 = arith.constant 0 : index
    %139 = vector.load %arg4[%c4_98, %c0_99, %c0_100] : memref<9x16x16xbf16, #tpu.memory_space<vmem>>, vector<1x16x16xbf16>
    %140 = vector.shape_cast %139 : vector<1x16x16xbf16> to vector<16x16xbf16>
    %cst_101 = arith.constant dense<0.000000e+00> : vector<16x256xf32>
    %141 = tpu.matmul %140, %138, %cst_101 {dimension_numbers = #tpu.dot_dimension_numbers<[1], [0], [0], [1], [0, 0, 1, 1], [], []>} : vector<16x16xbf16>, vector<16x256xbf16>, vector<16x256xf32> -> vector<16x256xf32>
    %142 = arith.addf %137, %141 : vector<16x256xf32>
    %c0_102 = arith.constant 0 : index
    %c129_103 = arith.constant 129 : index
    %143 = vector.load %arg10[%c0_102, %c129_103] : memref<16x512xbf16, #tpu.memory_space<vmem>>, vector<16x256xbf16>
    %144 = arith.select %114, %143, %115 : vector<16x256xi1>, vector<16x256xbf16>
    %c5_104 = arith.constant 5 : index
    %c0_105 = arith.constant 0 : index
    %c0_106 = arith.constant 0 : index
    %145 = vector.load %arg4[%c5_104, %c0_105, %c0_106] : memref<9x16x16xbf16, #tpu.memory_space<vmem>>, vector<1x16x16xbf16>
    %146 = vector.shape_cast %145 : vector<1x16x16xbf16> to vector<16x16xbf16>
    %cst_107 = arith.constant dense<0.000000e+00> : vector<16x256xf32>
    %147 = tpu.matmul %146, %144, %cst_107 {dimension_numbers = #tpu.dot_dimension_numbers<[1], [0], [0], [1], [0, 0, 1, 1], [], []>} : vector<16x16xbf16>, vector<16x256xbf16>, vector<16x256xf32> -> vector<16x256xf32>
    %148 = arith.addf %142, %147 : vector<16x256xf32>
    %c0_108 = arith.constant 0 : index
    %c143_109 = arith.constant 143 : index
    %149 = vector.load %arg10[%c0_108, %c143_109] : memref<16x512xbf16, #tpu.memory_space<vmem>>, vector<16x256xbf16>
    %150 = arith.select %112, %149, %115 : vector<16x256xi1>, vector<16x256xbf16>
    %c6_110 = arith.constant 6 : index
    %c0_111 = arith.constant 0 : index
    %c0_112 = arith.constant 0 : index
    %151 = vector.load %arg4[%c6_110, %c0_111, %c0_112] : memref<9x16x16xbf16, #tpu.memory_space<vmem>>, vector<1x16x16xbf16>
    %152 = vector.shape_cast %151 : vector<1x16x16xbf16> to vector<16x16xbf16>
    %cst_113 = arith.constant dense<0.000000e+00> : vector<16x256xf32>
    %153 = tpu.matmul %152, %150, %cst_113 {dimension_numbers = #tpu.dot_dimension_numbers<[1], [0], [0], [1], [0, 0, 1, 1], [], []>} : vector<16x16xbf16>, vector<16x256xbf16>, vector<16x256xf32> -> vector<16x256xf32>
    %154 = arith.addf %148, %153 : vector<16x256xf32>
    %c0_114 = arith.constant 0 : index
    %c144_115 = arith.constant 144 : index
    %155 = vector.load %arg10[%c0_114, %c144_115] : memref<16x512xbf16, #tpu.memory_space<vmem>>, vector<16x256xbf16>
    %c7_116 = arith.constant 7 : index
    %c0_117 = arith.constant 0 : index
    %c0_118 = arith.constant 0 : index
    %156 = vector.load %arg4[%c7_116, %c0_117, %c0_118] : memref<9x16x16xbf16, #tpu.memory_space<vmem>>, vector<1x16x16xbf16>
    %157 = vector.shape_cast %156 : vector<1x16x16xbf16> to vector<16x16xbf16>
    %cst_119 = arith.constant dense<0.000000e+00> : vector<16x256xf32>
    %158 = tpu.matmul %157, %155, %cst_119 {dimension_numbers = #tpu.dot_dimension_numbers<[1], [0], [0], [1], [0, 0, 1, 1], [], []>} : vector<16x16xbf16>, vector<16x256xbf16>, vector<16x256xf32> -> vector<16x256xf32>
    %159 = arith.addf %154, %158 : vector<16x256xf32>
    %c0_120 = arith.constant 0 : index
    %c145_121 = arith.constant 145 : index
    %160 = vector.load %arg10[%c0_120, %c145_121] : memref<16x512xbf16, #tpu.memory_space<vmem>>, vector<16x256xbf16>
    %161 = arith.select %114, %160, %115 : vector<16x256xi1>, vector<16x256xbf16>
    %c8_122 = arith.constant 8 : index
    %c0_123 = arith.constant 0 : index
    %c0_124 = arith.constant 0 : index
    %162 = vector.load %arg4[%c8_122, %c0_123, %c0_124] : memref<9x16x16xbf16, #tpu.memory_space<vmem>>, vector<1x16x16xbf16>
    %163 = vector.shape_cast %162 : vector<1x16x16xbf16> to vector<16x16xbf16>
    %cst_125 = arith.constant dense<0.000000e+00> : vector<16x256xf32>
    %164 = tpu.matmul %163, %161, %cst_125 {dimension_numbers = #tpu.dot_dimension_numbers<[1], [0], [0], [1], [0, 0, 1, 1], [], []>} : vector<16x16xbf16>, vector<16x256xbf16>, vector<16x256xf32> -> vector<16x256xf32>
    %165 = arith.addf %159, %164 : vector<16x256xf32>
    %c0_126 = arith.constant 0 : index
    %c0_127 = arith.constant 0 : index
    %166 = vector.load %arg5[%c0_126, %c0_127] : memref<16x1xf32, #tpu.memory_space<vmem>>, vector<16x1xf32>
    %167 = vector.broadcast %166 : vector<16x1xf32> to vector<16x256xf32>
    %168 = arith.addf %165, %167 : vector<16x256xf32>
    %cst_128 = arith.constant 0.000000e+00 : f32
    %169 = vector.broadcast %cst_128 : f32 to vector<16x256xf32>
    %170 = arith.maximumf %168, %169 : vector<16x256xf32>
    %171 = arith.truncf %170 : vector<16x256xf32> to vector<16x256xbf16>
    %c0_129 = arith.constant 0 : index
    %c128_130 = arith.constant 128 : index
    %172 = vector.load %arg11[%c0_129, %c128_130] : memref<16x512xbf16, #tpu.memory_space<vmem>>, vector<16x256xbf16>
    tpu.vector_store %arg11[%c0_129, %c128_130], %171 {strides = array<i32>} : memref<16x512xbf16, #tpu.memory_space<vmem>>, vector<16x256xbf16>,
    %173 = tpu.iota {dimensions = array<i32: 1>} : vector<16x256xi32>
    %c16_i32_131 = arith.constant 16 : i32
    %c0_i32_132 = arith.constant 0 : i32
    %174 = arith.cmpi eq, %c16_i32_131, %c0_i32_132 : i32
    %c1_i32_133 = arith.constant 1 : i32
    %175 = arith.select %174, %c1_i32_133, %c16_i32_131 : i32
    %176 = vector.broadcast %175 : i32 to vector<16x256xi32>
    %177 = arith.remsi %173, %176 : vector<16x256xi32>
    %c0_i32_134 = arith.constant 0 : i32
    %178 = vector.broadcast %c0_i32_134 : i32 to vector<16x256xi32>
    %179 = arith.cmpi ne, %177, %178 : vector<16x256xi32>
    %c0_i32_135 = arith.constant 0 : i32
    %180 = vector.broadcast %c0_i32_135 : i32 to vector<16x256xi32>
    %181 = arith.cmpi slt, %177, %180 : vector<16x256xi32>
    %c0_i32_136 = arith.constant 0 : i32
    %182 = arith.cmpi slt, %175, %c0_i32_136 : i32
    %183 = vector.broadcast %182 : i1 to vector<16x256xi1>
    %184 = vector.broadcast %183 : vector<16x256xi1> to vector<16x256xi1>
    %185 = arith.xori %181, %184 : vector<16x256xi1>
    %186 = arith.andi %185, %179 : vector<16x256xi1>
    %187 = vector.broadcast %175 : i32 to vector<16x256xi32>
    %188 = arith.addi %177, %187 : vector<16x256xi32>
    %189 = arith.select %186, %188, %177 : vector<16x256xi1>, vector<16x256xi32>
    %c0_i32_137 = arith.constant 0 : i32
    %190 = vector.broadcast %c0_i32_137 : i32 to vector<16x256xi32>
    %191 = arith.cmpi ne, %189, %190 : vector<16x256xi32>
    %c15_i32_138 = arith.constant 15 : i32
    %192 = vector.broadcast %c15_i32_138 : i32 to vector<16x256xi32>
    %193 = arith.cmpi ne, %189, %192 : vector<16x256xi32>
    %cst_139 = arith.constant 0.000000e+00 : bf16
    %194 = vector.broadcast %cst_139 : bf16 to vector<16x256xbf16>
    %c0_140 = arith.constant 0 : index
    %c111_141 = arith.constant 111 : index
    %195 = vector.load %arg11[%c0_140, %c111_141] : memref<16x512xbf16, #tpu.memory_space<vmem>>, vector<16x256xbf16>
    %196 = arith.select %191, %195, %194 : vector<16x256xi1>, vector<16x256xbf16>
    %c0_142 = arith.constant 0 : index
    %c0_143 = arith.constant 0 : index
    %c0_144 = arith.constant 0 : index
    %197 = vector.load %arg6[%c0_142, %c0_143, %c0_144] : memref<9x16x16xbf16, #tpu.memory_space<vmem>>, vector<1x16x16xbf16>
    %198 = vector.shape_cast %197 : vector<1x16x16xbf16> to vector<16x16xbf16>
    %cst_145 = arith.constant dense<0.000000e+00> : vector<16x256xf32>
    %199 = tpu.matmul %198, %196, %cst_145 {dimension_numbers = #tpu.dot_dimension_numbers<[1], [0], [0], [1], [0, 0, 1, 1], [], []>} : vector<16x16xbf16>, vector<16x256xbf16>, vector<16x256xf32> -> vector<16x256xf32>
    %c0_146 = arith.constant 0 : index
    %c112_147 = arith.constant 112 : index
    %200 = vector.load %arg11[%c0_146, %c112_147] : memref<16x512xbf16, #tpu.memory_space<vmem>>, vector<16x256xbf16>
    %c1_148 = arith.constant 1 : index
    %c0_149 = arith.constant 0 : index
    %c0_150 = arith.constant 0 : index
    %201 = vector.load %arg6[%c1_148, %c0_149, %c0_150] : memref<9x16x16xbf16, #tpu.memory_space<vmem>>, vector<1x16x16xbf16>
    %202 = vector.shape_cast %201 : vector<1x16x16xbf16> to vector<16x16xbf16>
    %cst_151 = arith.constant dense<0.000000e+00> : vector<16x256xf32>
    %203 = tpu.matmul %202, %200, %cst_151 {dimension_numbers = #tpu.dot_dimension_numbers<[1], [0], [0], [1], [0, 0, 1, 1], [], []>} : vector<16x16xbf16>, vector<16x256xbf16>, vector<16x256xf32> -> vector<16x256xf32>
    %204 = arith.addf %199, %203 : vector<16x256xf32>
    %c0_152 = arith.constant 0 : index
    %c113_153 = arith.constant 113 : index
    %205 = vector.load %arg11[%c0_152, %c113_153] : memref<16x512xbf16, #tpu.memory_space<vmem>>, vector<16x256xbf16>
    %206 = arith.select %193, %205, %194 : vector<16x256xi1>, vector<16x256xbf16>
    %c2_154 = arith.constant 2 : index
    %c0_155 = arith.constant 0 : index
    %c0_156 = arith.constant 0 : index
    %207 = vector.load %arg6[%c2_154, %c0_155, %c0_156] : memref<9x16x16xbf16, #tpu.memory_space<vmem>>, vector<1x16x16xbf16>
    %208 = vector.shape_cast %207 : vector<1x16x16xbf16> to vector<16x16xbf16>
    %cst_157 = arith.constant dense<0.000000e+00> : vector<16x256xf32>
    %209 = tpu.matmul %208, %206, %cst_157 {dimension_numbers = #tpu.dot_dimension_numbers<[1], [0], [0], [1], [0, 0, 1, 1], [], []>} : vector<16x16xbf16>, vector<16x256xbf16>, vector<16x256xf32> -> vector<16x256xf32>
    %210 = arith.addf %204, %209 : vector<16x256xf32>
    %c0_158 = arith.constant 0 : index
    %c127_159 = arith.constant 127 : index
    %211 = vector.load %arg11[%c0_158, %c127_159] : memref<16x512xbf16, #tpu.memory_space<vmem>>, vector<16x256xbf16>
    %212 = arith.select %191, %211, %194 : vector<16x256xi1>, vector<16x256xbf16>
    %c3_160 = arith.constant 3 : index
    %c0_161 = arith.constant 0 : index
    %c0_162 = arith.constant 0 : index
    %213 = vector.load %arg6[%c3_160, %c0_161, %c0_162] : memref<9x16x16xbf16, #tpu.memory_space<vmem>>, vector<1x16x16xbf16>
    %214 = vector.shape_cast %213 : vector<1x16x16xbf16> to vector<16x16xbf16>
    %cst_163 = arith.constant dense<0.000000e+00> : vector<16x256xf32>
    %215 = tpu.matmul %214, %212, %cst_163 {dimension_numbers = #tpu.dot_dimension_numbers<[1], [0], [0], [1], [0, 0, 1, 1], [], []>} : vector<16x16xbf16>, vector<16x256xbf16>, vector<16x256xf32> -> vector<16x256xf32>
    %216 = arith.addf %210, %215 : vector<16x256xf32>
    %c0_164 = arith.constant 0 : index
    %c128_165 = arith.constant 128 : index
    %217 = vector.load %arg11[%c0_164, %c128_165] : memref<16x512xbf16, #tpu.memory_space<vmem>>, vector<16x256xbf16>
    %c4_166 = arith.constant 4 : index
    %c0_167 = arith.constant 0 : index
    %c0_168 = arith.constant 0 : index
    %218 = vector.load %arg6[%c4_166, %c0_167, %c0_168] : memref<9x16x16xbf16, #tpu.memory_space<vmem>>, vector<1x16x16xbf16>
    %219 = vector.shape_cast %218 : vector<1x16x16xbf16> to vector<16x16xbf16>
    %cst_169 = arith.constant dense<0.000000e+00> : vector<16x256xf32>
    %220 = tpu.matmul %219, %217, %cst_169 {dimension_numbers = #tpu.dot_dimension_numbers<[1], [0], [0], [1], [0, 0, 1, 1], [], []>} : vector<16x16xbf16>, vector<16x256xbf16>, vector<16x256xf32> -> vector<16x256xf32>
    %221 = arith.addf %216, %220 : vector<16x256xf32>
    %c0_170 = arith.constant 0 : index
    %c129_171 = arith.constant 129 : index
    %222 = vector.load %arg11[%c0_170, %c129_171] : memref<16x512xbf16, #tpu.memory_space<vmem>>, vector<16x256xbf16>
    %223 = arith.select %193, %222, %194 : vector<16x256xi1>, vector<16x256xbf16>
    %c5_172 = arith.constant 5 : index
    %c0_173 = arith.constant 0 : index
    %c0_174 = arith.constant 0 : index
    %224 = vector.load %arg6[%c5_172, %c0_173, %c0_174] : memref<9x16x16xbf16, #tpu.memory_space<vmem>>, vector<1x16x16xbf16>
    %225 = vector.shape_cast %224 : vector<1x16x16xbf16> to vector<16x16xbf16>
    %cst_175 = arith.constant dense<0.000000e+00> : vector<16x256xf32>
    %226 = tpu.matmul %225, %223, %cst_175 {dimension_numbers = #tpu.dot_dimension_numbers<[1], [0], [0], [1], [0, 0, 1, 1], [], []>} : vector<16x16xbf16>, vector<16x256xbf16>, vector<16x256xf32> -> vector<16x256xf32>
    %227 = arith.addf %221, %226 : vector<16x256xf32>
    %c0_176 = arith.constant 0 : index
    %c143_177 = arith.constant 143 : index
    %228 = vector.load %arg11[%c0_176, %c143_177] : memref<16x512xbf16, #tpu.memory_space<vmem>>, vector<16x256xbf16>
    %229 = arith.select %191, %228, %194 : vector<16x256xi1>, vector<16x256xbf16>
    %c6_178 = arith.constant 6 : index
    %c0_179 = arith.constant 0 : index
    %c0_180 = arith.constant 0 : index
    %230 = vector.load %arg6[%c6_178, %c0_179, %c0_180] : memref<9x16x16xbf16, #tpu.memory_space<vmem>>, vector<1x16x16xbf16>
    %231 = vector.shape_cast %230 : vector<1x16x16xbf16> to vector<16x16xbf16>
    %cst_181 = arith.constant dense<0.000000e+00> : vector<16x256xf32>
    %232 = tpu.matmul %231, %229, %cst_181 {dimension_numbers = #tpu.dot_dimension_numbers<[1], [0], [0], [1], [0, 0, 1, 1], [], []>} : vector<16x16xbf16>, vector<16x256xbf16>, vector<16x256xf32> -> vector<16x256xf32>
    %233 = arith.addf %227, %232 : vector<16x256xf32>
    %c0_182 = arith.constant 0 : index
    %c144_183 = arith.constant 144 : index
    %234 = vector.load %arg11[%c0_182, %c144_183] : memref<16x512xbf16, #tpu.memory_space<vmem>>, vector<16x256xbf16>
    %c7_184 = arith.constant 7 : index
    %c0_185 = arith.constant 0 : index
    %c0_186 = arith.constant 0 : index
    %235 = vector.load %arg6[%c7_184, %c0_185, %c0_186] : memref<9x16x16xbf16, #tpu.memory_space<vmem>>, vector<1x16x16xbf16>
    %236 = vector.shape_cast %235 : vector<1x16x16xbf16> to vector<16x16xbf16>
    %cst_187 = arith.constant dense<0.000000e+00> : vector<16x256xf32>
    %237 = tpu.matmul %236, %234, %cst_187 {dimension_numbers = #tpu.dot_dimension_numbers<[1], [0], [0], [1], [0, 0, 1, 1], [], []>} : vector<16x16xbf16>, vector<16x256xbf16>, vector<16x256xf32> -> vector<16x256xf32>
    %238 = arith.addf %233, %237 : vector<16x256xf32>
    %c0_188 = arith.constant 0 : index
    %c145_189 = arith.constant 145 : index
    %239 = vector.load %arg11[%c0_188, %c145_189] : memref<16x512xbf16, #tpu.memory_space<vmem>>, vector<16x256xbf16>
    %240 = arith.select %193, %239, %194 : vector<16x256xi1>, vector<16x256xbf16>
    %c8_190 = arith.constant 8 : index
    %c0_191 = arith.constant 0 : index
    %c0_192 = arith.constant 0 : index
    %241 = vector.load %arg6[%c8_190, %c0_191, %c0_192] : memref<9x16x16xbf16, #tpu.memory_space<vmem>>, vector<1x16x16xbf16>
    %242 = vector.shape_cast %241 : vector<1x16x16xbf16> to vector<16x16xbf16>
    %cst_193 = arith.constant dense<0.000000e+00> : vector<16x256xf32>
    %243 = tpu.matmul %242, %240, %cst_193 {dimension_numbers = #tpu.dot_dimension_numbers<[1], [0], [0], [1], [0, 0, 1, 1], [], []>} : vector<16x16xbf16>, vector<16x256xbf16>, vector<16x256xf32> -> vector<16x256xf32>
    %244 = arith.addf %238, %243 : vector<16x256xf32>
    %c0_194 = arith.constant 0 : index
    %c0_195 = arith.constant 0 : index
    %245 = vector.load %arg7[%c0_194, %c0_195] : memref<16x1xf32, #tpu.memory_space<vmem>>, vector<16x1xf32>
    %246 = vector.broadcast %245 : vector<16x1xf32> to vector<16x256xf32>
    %247 = arith.addf %244, %246 : vector<16x256xf32>
    %c0_196 = arith.constant 0 : index
    %c0_197 = arith.constant 0 : index
    %c128_198 = arith.constant 128 : index
    %248 = vector.load %arg1[%c0_196, %c0_197, %c128_198] : memref<1x8x512xbf16, #tpu.memory_space<vmem>>, vector<1x8x256xbf16>
    %249 = vector.shape_cast %248 : vector<1x8x256xbf16> to vector<8x256xbf16>
    %c0_199 = arith.constant 0 : index
    %c0_200 = arith.constant 0 : index
    %250 = vector.load %arg8[%c0_199, %c0_200] : memref<16x8xbf16, #tpu.memory_space<vmem>>, vector<16x8xbf16>
    %cst_201 = arith.constant dense<0.000000e+00> : vector<16x256xf32>
    %251 = tpu.matmul %250, %249, %cst_201 {dimension_numbers = #tpu.dot_dimension_numbers<[1], [0], [0], [1], [0, 0, 1, 1], [], []>} : vector<16x8xbf16>, vector<8x256xbf16>, vector<16x256xf32> -> vector<16x256xf32>
    %252 = arith.addf %247, %251 : vector<16x256xf32>
    %cst_202 = arith.constant 0.000000e+00 : f32
    %253 = vector.broadcast %cst_202 : f32 to vector<16x256xf32>
    %254 = arith.maximumf %252, %253 : vector<16x256xf32>
    %c0_203 = arith.constant 0 : index
    %c0_204 = arith.constant 0 : index
    %c0_205 = arith.constant 0 : index
    %255 = vector.load %arg9[%c0_203, %c0_204, %c0_205] : memref<1x16x256xf32, #tpu.memory_space<vmem>>, vector<1x16x256xf32>
    %256 = vector.shape_cast %255 : vector<1x16x256xf32> to vector<16x256xf32>
    %257 = vector.shape_cast %254 : vector<16x256xf32> to vector<1x16x256xf32>
    tpu.vector_store %arg9[%c0_203, %c0_204, %c0_205], %257 {strides = array<i32>} : memref<1x16x256xf32, #tpu.memory_space<vmem>>, vector<1x16x256xf32>,
    return
  }
  func.func @transform_0(%arg0: i32) -> (i32, i32, i32) {
    %c0_i32 = arith.constant 0 : i32
    %c0_i32_0 = arith.constant 0 : i32
    %c0_i32_1 = arith.constant 0 : i32
    return %arg0, %c0_i32, %c0_i32_0 : i32, i32, i32
  }
  func.func @transform_1(%arg0: i32) -> (i32, i32, i32) {
    %c0_i32 = arith.constant 0 : i32
    %c0_i32_0 = arith.constant 0 : i32
    %c0_i32_1 = arith.constant 0 : i32
    %c0_i32_2 = arith.constant 0 : i32
    return %c0_i32, %c0_i32_0, %c0_i32_1 : i32, i32, i32
  }
  func.func @transform_2(%arg0: i32) -> (i32, i32) {
    %c0_i32 = arith.constant 0 : i32
    %c0_i32_0 = arith.constant 0 : i32
    %c0_i32_1 = arith.constant 0 : i32
    return %c0_i32, %c0_i32_0 : i32, i32
  }
  func.func @transform_3(%arg0: i32) -> (i32, i32, i32) {
    %c0_i32 = arith.constant 0 : i32
    %c0_i32_0 = arith.constant 0 : i32
    %c0_i32_1 = arith.constant 0 : i32
    %c0_i32_2 = arith.constant 0 : i32
    return %c0_i32, %c0_i32_0, %c0_i32_1 : i32, i32, i32
  }
  func.func @transform_4(%arg0: i32) -> (i32, i32) {
    %c0_i32 = arith.constant 0 : i32
    %c0_i32_0 = arith.constant 0 : i32
    %c0_i32_1 = arith.constant 0 : i32
    return %c0_i32, %c0_i32_0 : i32, i32
  }
  func.func @transform_5(%arg0: i32) -> (i32, i32, i32) {
    %c0_i32 = arith.constant 0 : i32
    %c0_i32_0 = arith.constant 0 : i32
    %c0_i32_1 = arith.constant 0 : i32
    %c0_i32_2 = arith.constant 0 : i32
    return %c0_i32, %c0_i32_0, %c0_i32_1 : i32, i32, i32
  }
  func.func @transform_6(%arg0: i32) -> (i32, i32) {
    %c0_i32 = arith.constant 0 : i32
    %c0_i32_0 = arith.constant 0 : i32
    %c0_i32_1 = arith.constant 0 : i32
    return %c0_i32, %c0_i32_0 : i32, i32
  }
  func.func @transform_7(%arg0: i32) -> (i32, i32) {
    %c0_i32 = arith.constant 0 : i32
    %c0_i32_0 = arith.constant 0 : i32
    %c0_i32_1 = arith.constant 0 : i32
    return %c0_i32, %c0_i32_0 : i32, i32
  }
  func.func @transform_8(%arg0: i32) -> (i32, i32, i32) {
    %c0_i32 = arith.constant 0 : i32
    %c0_i32_0 = arith.constant 0 : i32
    %c0_i32_1 = arith.constant 0 : i32
    return %arg0, %c0_i32, %c0_i32_0 : i32, i32, i32
  }
}

</mosaic_0001>

<bundles_post_ra>
// kernel: tpu_custom_call.1
= control target key start
LH: loop header
LB: loop body
LE: loop exit
PB: predicated region body
PF: predicated region fallthrough
CT: control target
= control target key end

     0   :  { %13 = vsyncpa [#allocation5], 0  ;;  %s4073_s0 = inlined_call_operand.hbm [shape: bf16[2,8,512], index: 0, kind: input, shape index: {}]   ;;  %s4074_s1 = inlined_call_operand.vmem [shape: bf16[9,16,8], index: 1, kind: input, shape index: {}]   ;;  %s4075_s2 = inlined_call_operand.vmem [shape: f32[16,1], index: 2, kind: input, shape index: {}]   ;;  %s4076_s3 = inlined_call_operand.vmem [shape: bf16[9,16,16], index: 3, kind: input, shape index: {}]   ;;  %s4077_s4 = inlined_call_operand.vmem [shape: f32[16,1], index: 4, kind: input, shape index: {}]   ;;  %s4078_s5 = inlined_call_operand.vmem [shape: bf16[9,16,16], index: 5, kind: input, shape index: {}]   ;;  %s4079_s6 = inlined_call_operand.vmem [shape: f32[16,1], index: 6, kind: input, shape index: {}]   ;;  %s4080_s7 = inlined_call_operand.vmem [shape: bf16[16,8], index: 7, kind: input, shape index: {}]   ;;  %s4081_s8 = inlined_call_operand.hbm [shape: f32[2,16,256], index: 8, kind: output, shape index: {}]  }
   0x1   :  { %15 = vsyncpa [#allocation5 + $0x1], 0 }
   0x2   :  { %16 = vsyncpa [#allocation6], 0 }
   0x3   :  { %18 = vsyncpa [#allocation6 + $0x1], 0  ;;  %s3335_s27 = smov 0   ;;  %s3337_s28 = smov 0  }
   0x4   :  { %s3339_s29 = smov 0   ;;  %s3341_s30 = smov 0  }
   0x5 LB: > { %s3356_s9 = sadd.s32 4294967295, %s3276_s30   ;;  %s2862_s10 = sadd.s32 4294967294, %s3276_s30   ;;  %s3276_s30 = sphi %s3341_s30, %s4168_s30   ;;  %s3272_s29 = sphi %s3339_s29, %s4167_s29   ;;  %s3268_s28 = sphi %s3337_s28, %s4166_s28   ;;  %s3264_s27 = sphi %s3335_s27, %s4165_s27  }
   0x6   : > { %s3360_s11 = sadd.s32 1, %s3276_s30   ;;  %s31_s12 = sadd.s32 1, %s3272_s29 }
   0x7   : > { %s28_s13 = ssub.s32 %s3276_s30, %s3360_s11  ;;  %p38_p0 = scmp.ne.s32.totalorder %s3272_s29, %s3268_s28 }
   0x8   : > { %p29_p1 = scmp.eq.s32.totalorder %s28_s13, 0  ;;  %p39_p2 = scmp.eq.s32.totalorder %s3276_s30, 0 }
   0x9   : > { %p44_p3 = scmp.ne.s32.totalorder %s3268_s28, %s3264_s27  ;;  %p45_p4 = scmp.eq.s32.totalorder %s3356_s9, 0 }
   0xa   : > { %s3372_s14 = scalar_select %p29_p1, %s3272_s29, %s31_s12  }
   0xb   : > { %p3374_p5 = por %p39_p2, %p38_p0  ;;  %p3378_p6 = por %p45_p4, %p44_p3 }
   0xc   : > { %4093 = sst [smem:[#allocation10_spill]] %s3372_s14  ;;  %p215_p7 = scmp.eq.s32.totalorder %s3356_s9, 1 }
   0xd   : > { %s4095_s16 = scalar_select %p3378_p6, 1, 0 }
   0xe   : > { %p221_p8 = scmp.eq.s32.totalorder %s2862_s10, 1  ;;  %p3092_p10 = scmp.lt.s32.totalorder %s3276_s30, 2 }
   0xf   : > { %p3385_p11 = por %p215_p7, %p38_p0  ;;  %s262_s19 = sand.u32 1, %s3272_s29  }
  0x10   : > { %p3389_p12 = por %p221_p8, %p44_p3  ;;  %s3074_s20 = sshll.u32 %s3276_s30, 8 }
  0x11   : > { %s4096_s17 = scalar_select %p3385_p11, 1, 0 }
  0x12   : > { %s4097_s18 = scalar_select %p3389_p12, 1, 0 }
  0x13   : > { %s2865_s21 = sshll.u32 %s262_s19, 4  ;;  %s3398_s24 = scalar_lea.hbm %s4073_s0, %s3074_s20 }
  0x14   : > { %s266_s25 = scalar_lea.vmem [#allocation4], %s2865_s21  ;;  %p3402_p13 = pnand %p3092_p10, %p3374_p5 }
  0x15   : > { %s274_s26 = sshll.u32 %s266_s25, 4  ;;  %s263_s12 = scalar_lea.sflag [#allocation5], %s262_s19  ;;  %s3406_s26 = int_to_ptr.vmem [resolvable:$true] %s274_s26 }
  0x16   : > { %s3184_s13 = scalar_lea.hbm %s3398_s24, 256  ;;  %p3186_p3 = pneg %p3402_p13 }
  0x17   : > { %p3185_p2 = scmp.ne.s32.totalorder %s3398_s24, %s3184_s13  ;;  %s3189_s15 = scalar_lea.hbm %s4073_s0, 512 }
  0x18   : > { %p3190_p5 = scmp.lt.s32.totalorder %s3398_s24, %s4073_s0  ;;  %p3191_p8 = scmp.lt.s32.totalorder %s3189_s15, %s3184_s13 }
  0x19   : > { %p3187_p4 = pnand %p3186_p3, %p3185_p2 }
  0x1a   : > { %p3192_p10 = por %p3191_p8, %p3190_p5 }
  0x1b   : > { %p3188_p7 = pneg %p3187_p4 }
  0x1d   : > { %p3193_p9 = pnand %p3192_p10, %p3188_p7 }
  0x1f   : > { %3196 = shalt.err (!%p3193_p9)
}
  0x20   : > { %s3197_s19 = scalar_lea.vmem %s3406_s26, 256  ;;  %s3278_s25 = smov [#allocation4]  }
  0x21   : > { %p3198_p0 = scmp.ne.s32.totalorder %s3406_s26, %s3197_s19  ;;  %s3202_s14 = sshll.u32 %s3278_s25, 4  ;;  %s3203_s14 = int_to_ptr.vmem [resolvable:$false] %s3202_s14 }
  0x22   : > { %s3204_s20 = scalar_lea.vmem %s3203_s14, 512  ;;  %p3205_p4 = scmp.lt.s32.totalorder %s3406_s26, %s3203_s14 }
  0x23   : > { %p3200_p1 = pnand %p3198_p0, %p3186_p3  ;;  %p3206_p12 = scmp.lt.s32.totalorder %s3204_s20, %s3197_s19 }
  0x25   : > { %p3201_p2 = pneg %p3200_p1  ;;  %p3207_p11 = por %p3206_p12, %p3205_p4 }
  0x27   : > { %p3208_p6 = pnand %p3207_p11, %p3201_p2 }
  0x29   : > { %3211 = shalt.err (!%p3208_p6)
}
  0x2a   : > { %3087 = dma.hbm_to_vmem [thread:$0]  (!%p3402_p13), %s3398_s24, 256, %s3406_s26, %s263_s12  }
  0x2b   : > { %p4099_p9 = scmp.lt.s32.totalorder %s3276_s30, 3  ;;  %p4100_p7 = scmp.ge.s32.totalorder %s3276_s30, 1 }
  0x2d   : > { %p280_p0 = pnand %p4100_p7, %p4099_p9 }
  0x2e   : > { %s3433_s13 = sand.u32 (!%p280_p0), 1, %s3268_s28   ;;  %p4101_p6 = scmp.ne.s32.totalorder (!%p280_p0), %s4095_s16, 0 }
  0x2f   : > { %283 = sbr.rel (%p280_p0) target bundleno = 1319 (0x527), region = 52  ;;  %s2869_s14 = sshll.u32 (!%p280_p0), %s3433_s13, 4 }
  0x30   : > { %s286_s21 = scalar_lea.sflag (!%p280_p0), [#allocation5], %s3433_s13  ;;  %s3437_s15 = scalar_lea.vmem (!%p280_p0), [#allocation4], %s2869_s14 }
  0x34   : > { %v333_v0 = vlaneseq }
  0x35   : > { %3255 = dma.done.wait (%p4101_p6), %s286_s21, 256  }
  0x36   : > { %3257 = vsyncadd (%p4101_p6), %s286_s21, 4294967040  ;;  %v3279_v1 = vmov 0   ;;  %v334_v2 = vand.u32 127, %v333_v0  ;;  %s3280_s16 = smov 111   ;;  %s3281_s24 = smov 127   ;;  %v3462_v8 = vld [vmem:[%s3437_s15] sm:$0xff] }
  0x37   : > { %325 = vst [vmem:[#allocation2] sm:$0xf] %v3279_v1  ;;  %326 = vst [vmem:[#allocation2 + $0x10] sm:$0xf] %v3279_v1  ;;  %3137 = vset.pattern.permute.xlu1 %v3279_v1  ;;  %3136 = vset.pattern.permute.xlu0 %v3279_v1  ;;  %s3282_s26 = smov 113   ;;  %s3283_s10 = smov 1   ;;  %v2874_v10 = vcombine.low %v3462_v8, %v3462_v8  ;;  %v2875_v11 = vcombine.high %v3462_v8, %v3462_v8 }
  0x38   : > { %327 = vst [vmem:[#allocation2 + $0xc] sm:$0xf] %v3279_v1  ;;  %328 = vst [vmem:[#allocation2 + $0x1c] sm:$0xf] %v3279_v1  ;;  %447 = vmatprep.mubr.bf16.mxu0 %v3279_v1  ;;  %521 = vmatprep.mubr.bf16.mxu1 %v3279_v1  ;;  %v335_v3 = vadd.s32 128, %v334_v2  ;;  %v340_v4 = vand.u32 15, %v334_v2 }
  0x39   : > { %329 = vst [vmem:[#allocation3] sm:$0xf] %v3279_v1  ;;  %330 = vst [vmem:[#allocation3 + $0x10] sm:$0xf] %v3279_v1  ;;  %v365_v9 = vld [vmem:[%s3437_s15 + $0x8] sm:$0xf] }
  0x3a   : > { %331 = vst [vmem:[#allocation3 + $0xc] sm:$0xf] %v3279_v1  ;;  %332 = vst [vmem:[#allocation3 + $0x1c] sm:$0xf] %v3279_v1  ;;  %v347_v5 = vand.u32 15, %v335_v3  ;;  %vm360_vm0 = vcmp.ne.s32.totalorder %v340_v4, 0  ;;  %v2876_v12 = vcombine.low %v365_v9, %v365_v9 }
  0x3b   : > { %vm362_vm1 = vcmp.ne.s32.totalorder %v340_v4, 15  ;;  %s3284_s12 = smov 15   ;;  %s3285_s22 = smov 17   ;;  %vm4092_vm8 = vcmask 908288   ;;  %v3487_v26 = vld [vmem:[%s3437_s15 + $0xc] sm:$0xf] }
  0x3c   : > { %vm361_vm2 = vcmp.ne.s32.totalorder %v347_v5, 0  ;;  %vm363_vm3 = vcmp.ne.s32.totalorder %v347_v5, 15  ;;  %s3286_s23 = smov 16   ;;  %vm537_vm11 = vcmask 924672   ;;  %vm627_vm14 = vcmask 1039360   ;;  %v3144_v53 = vld [vmem:[%s4074_s1 + $0x8] sm:$0xff]  }
  0x3d   : > { %vm366_vm4 = vmpackc.low %vm361_vm2, %vm360_vm0  ;;  %vm4084_vm15 = vcmask 130048   ;;  %v784_v60 = vld [vmem:[%s3437_s15 + $0x4] sm:$0xff]  ;;  %s3287_s20 = smov 112   ;;  %s2776_s19 = scalar_lea.sflag [#allocation6], %s3433_s13 }
  0x3e   : > { %v367_v6 = vsel %vm366_vm4, 65537, %v3279_v1  ;;  %vm532_vm5 = vmpackc.low %vm363_vm3, %vm362_vm1  ;;  %vm4091_vm1 = vcmask 1043456   ;;  %vm4089_vm3 = vcmask 7168   ;;  %vm4090_vm4 = vcmask 64512   ;;  %p4161_p12 = scmp.ne.s32.totalorder %s4096_s17, 0 }
  0x3f   : > { %368 = vrot.lane.b32.xlu0 %v367_v6, %s3280_s16  ;;  %624 = vrot.lane.b32.xlu1 %v367_v6, %s3281_s24  ;;  %v533_v7 = vsel %vm532_vm5, 65537, %v3279_v1  ;;  %vm565_vm5 = vcmask 121856   ;;  %v3557_v61 = vcombine.low %v784_v60, %v784_v60  ;;  %v3559_v62 = vcombine.high %v784_v60, %v784_v60 }
  0x43   : > { %534 = vrot.lane.b32.xlu0 %v533_v7, %s3282_s26  ;;  %786 = vrot.lane.b32.xlu1 %v533_v7, %s3283_s10 }
  0x47   : > { %874 = vrot.lane.b32.xlu0 %v367_v6, %s3284_s12  ;;  %1043 = vrot.lane.b32.xlu1 %v533_v7, %s3285_s22 }
  0x4b   : > { %395 = vrot.lane.b32.xlu0 %v2874_v10, %s3286_s23  ;;  %397 = vrot.lane.b32.xlu1 %v2875_v11, %s3286_s23  ;;  %v2929_v11 = vcombine.low %v3487_v26, %v3487_v26 }
  0x4f   : > { %399 = vrot.lane.b32.xlu0 %v2876_v12, %s3286_s23 }
  0xb1   : > { %v369_v13 = vpop.permute.xlu0 %368  ;;  %v625_v14 = vpop.permute.xlu1 %624 }
  0xb2   : > { %v370_v15 = vrot.slane %v369_v13, 4  ;;  %v626_v16 = vrot.slane %v625_v14, 4 }
  0xb4   : > { %vm3474_vm6 = vcmp.ne.s16.totalorder %v370_v15, 0  ;;  %vm3478_vm7 = vcmp.ne.s16.totalorder %v626_v16, 0  ;;  %v3499_v30 = vsel %vm4092_vm8, %v370_v15, %v369_v13  ;;  %v3528_v45 = vsel %vm627_vm14, %v626_v16, %v625_v14  ;;  %v3598_v16 = vld [vmem:[#allocation2 + $0xc] sm:$0xf] }
  0xb5   : > { %v535_v19 = vpop.permute.xlu0 %534  ;;  %v787_v20 = vpop.permute.xlu1 %786  ;;  %v376_v21 = vsel %vm3474_vm6, %v365_v9, 0  ;;  %v632_v22 = vsel %vm3478_vm7, %v365_v9, 0  ;;  %vm4088_vm12 = vcmp.ne.s16.totalorder %v3499_v30, 0  ;;  %vm4085_vm2 = vcmp.ne.s16.totalorder %v3528_v45, 0 }
  0xb6   : > { %v536_v23 = vrot.slane %v535_v19, 4  ;;  %v788_v24 = vrot.slane %v787_v20, 4  ;;  %v2882_v25 = vcombine.low %v376_v21, %v376_v21  ;;  %v2898_v29 = vcombine.low %v632_v22, %v632_v22  ;;  %v1132_v21 = vld [vmem:[%s4075_s2 + $0x8] sm:$0xff] }
  0xb7   : > { %v375_v43 = vsel %vm4088_vm12, %v3462_v8, 0  ;;  %v631_v56 = vsel %vm4085_vm2, %v3462_v8, 0  ;;  %vm477_vm2 = vcmask 138240  }
  0xb8   : > { %vm3489_vm9 = vcmp.ne.s16.totalorder %v536_v23, 0  ;;  %vm3493_vm10 = vcmp.ne.s16.totalorder %v788_v24, 0  ;;  %475 = vrot.lane.b32.xlu1 %v2882_v25, %s3285_s22  ;;  %v3516_v39 = vsel %vm537_vm11, %v536_v23, %v535_v19  ;;  %v2881_v47 = vcombine.high %v375_v43, %v375_v43  ;;  %v3600_v19 = vld [vmem:[#allocation2 + $0x1c] sm:$0xf] }
  0xb9   : > { %v875_v31 = vpop.permute.xlu0 %874  ;;  %v542_v32 = vsel %vm3489_vm9, %v365_v9, 0  ;;  %v793_v33 = vsel %vm3493_vm10, %v3487_v26, 0  ;;  %v3506_v36 = vpop.permute.xlu1 %1043  ;;  %vm4086_vm0 = vcmp.ne.s16.totalorder %v3516_v39, 0  ;;  %v2880_v48 = vcombine.low %v375_v43, %v375_v43  ;;  %v3145_v43 = vld [vmem:[%s4074_s1] sm:$0xff]  }
  0xba   : > { %v876_v34 = vrot.slane %v875_v31, 4  ;;  %v2890_v35 = vcombine.low %v542_v32, %v542_v32  ;;  %v2913_v38 = vcombine.low %v793_v33, %v793_v33  ;;  %v541_v50 = vsel %vm4086_vm0, %v3462_v8, 0 }
  0xbb   : > { %v2888_v54 = vcombine.low %v541_v50, %v541_v50  ;;  %v2889_v55 = vcombine.high %v541_v50, %v541_v50  ;;  %v3549_v57 = vsel %vm4089_vm3, %v788_v24, %v787_v20  ;;  %v2897_v58 = vcombine.high %v631_v56, %v631_v56  ;;  %v1131_v20 = vld [vmem:[%s4075_s2] sm:$0xff]  ;;  %v3146_v50 = vld [vmem:[%s4074_s1 + $0x10] sm:$0xff]  }
  0xbc   : > { %vm3509_vm13 = vcmp.ne.s16.totalorder %v876_v34, 0  ;;  %653 = vrot.lane.b32.xlu1 %v2898_v29, %s3283_s10  ;;  %563 = vrot.lane.b32.xlu0 %v2890_v35, %s3284_s12  ;;  %v2896_v59 = vcombine.low %v631_v56, %v631_v56  ;;  %v3562_v63 = vsel %vm565_vm5, %v876_v34, %v875_v31  ;;  %v1045_v0 = vrot.slane %v3506_v36, 4 }
  0xbd   : > { %v881_v40 = vsel %vm3509_vm13, %v3487_v26, 0  ;;  %v396_v41 = vpop.permute.xlu0 %395  ;;  %v398_v44 = vpop.permute.xlu1 %397  ;;  %vm878_vm0 = vcmp.ne.s16.totalorder %v3562_v63, 0  ;;  %v1657_v22 = vsel %vm3509_vm13, %v3598_v16, 0  ;;  %v1659_v23 = vsel %vm3509_vm13, %v3600_v19, 0 }
  0xbe   : > { %v2921_v42 = vcombine.low %v881_v40, %v881_v40  ;;  %v402_v51 = vsel %vm4084_vm15, %v396_v41, %v398_v44  ;;  %v3574_v3 = vsel %vm477_vm2, %v1045_v0, %v3506_v36  ;;  %v880_v6 = vsel %vm878_vm0, %v784_v60, 0 }
  0xbf   : > { %v410_v52 = vsel %vm4091_vm1, %v402_v51, 0  ;;  %v2920_v7 = vcombine.high %v880_v6, %v880_v6  ;;  %v2919_v8 = vcombine.low %v880_v6, %v880_v6  ;;  %vm3583_vm12 = vcmp.ne.s16.totalorder %v1045_v0, 0  ;;  %v3149_v6 = vld [vmem:[%s4074_s1 + $0x28] sm:$0xff]  }
  0xc0   : > { %902 = vrot.lane.b32.xlu1 %v2921_v42, %s3282_s26  ;;  %814 = vrot.lane.b32.xlu0 %v2913_v38, %s3281_s24  ;;  %v1050_v13 = vsel %vm3583_vm12, %v3487_v26, 0  ;;  %v1572_v24 = vsel %vm3493_vm10, %v3598_v16, 0  ;;  %v1574_v25 = vsel %vm3493_vm10, %v3600_v19, 0  ;;  %v2986_v26 = vcombine.low %v1657_v22, %v1659_v23  ;;  %v3151_v23 = vld [vmem:[%s4074_s1 + $0x38] sm:$0xff]  }
  0xc1   : > { %v400_v46 = vpop.permute.xlu0 %399  ;;  %v2937_v15 = vcombine.low %v1050_v13, %v1050_v13  ;;  %v2979_v29 = vcombine.low %v1572_v24, %v1574_v25  ;;  %v3150_v13 = vld [vmem:[%s4074_s1 + $0x30] sm:$0xff]  }
  0xc2   : > { %v403_v49 = vsel %vm4084_vm15, %v398_v44, %v400_v46  ;;  %vm4087_vm15 = vcmp.ne.s16.totalorder %v3549_v57, 0 }
  0xc3   : > { %2877 = vmatprep.subr.msk.bf16.mxu0 %vm4091_vm1, %v403_v49  ;;  %v792_v2 = vsel %vm4087_vm15, %v784_v60, 0  ;;  %vm1047_vm15 = vcmp.ne.s16.totalorder %v3574_v3, 0  ;;  %v2682_v3 = vld [vmem:[%s4079_s6] sm:$0xff] }
  0xc4   : > { %473 = vrot.lane.b32.xlu0 %v2881_v47, %s3285_s22  ;;  %471 = vrot.lane.b32.xlu1 %v2880_v48, %s3285_s22  ;;  %v2911_v4 = vcombine.low %v792_v2, %v792_v2  ;;  %v2912_v5 = vcombine.high %v792_v2, %v792_v2  ;;  %v1049_v9 = vsel %vm1047_vm15, %v784_v60, 0 }
  0xc5   : > { %430 = vmatpush1.bf16.msra.mxu0 %v410_v52  ;;  %v2935_v12 = vcombine.low %v1049_v9, %v1049_v9  ;;  %v2936_v14 = vcombine.high %v1049_v9, %v1049_v9 }
  0xc8   : > { %559 = vrot.lane.b32.xlu0 %v2888_v54, %s3284_s12  ;;  %561 = vrot.lane.b32.xlu1 %v2889_v55, %s3284_s12 }
  0xc9   : > { %2878 = vmatmul.mubr.msk.bf16.vlgmr.msra.gmra.mxu0 %vm4090_vm4, %v3144_v53  ;;  %v732_v53 = vsel %vm4091_vm1, %v3557_v61, 0 }
  0xca   : > { %609 = vmatprep.mubr.bf16.mxu0 %v3279_v1 }
  0xcc   : > { %651 = vrot.lane.b32.xlu0 %v2897_v58, %s3283_s10  ;;  %649 = vrot.lane.b32.xlu1 %v2896_v59, %s3283_s10  ;;  %v3147_v58 = vld [vmem:[%s4074_s1 + $0x18] sm:$0xff]  }
  0xd0   : > { %978 = vrot.lane.b32.xlu0 %v3557_v61, %s3287_s20  ;;  %980 = vrot.lane.b32.xlu1 %v3559_v62, %s3287_s20  ;;  %v3148_v61 = vld [vmem:[%s4074_s1 + $0x20] sm:$0xff]  }
  0xd4   : > { %810 = vrot.lane.b32.xlu0 %v2911_v4, %s3281_s24  ;;  %812 = vrot.lane.b32.xlu1 %v2912_v5, %s3281_s24 }
  0xd8   : > { %900 = vrot.lane.b32.xlu0 %v2920_v7, %s3282_s26  ;;  %898 = vrot.lane.b32.xlu1 %v2919_v8, %s3282_s26 }
  0xdc   : > { %982 = vrot.lane.b32.xlu0 %v2929_v11, %s3287_s20  ;;  %1067 = vrot.lane.b32.xlu1 %v2935_v12, %s3280_s16 }
  0xe0   : > { %1069 = vrot.lane.b32.xlu0 %v2936_v14, %s3280_s16  ;;  %1071 = vrot.lane.b32.xlu1 %v2937_v15, %s3280_s16 }
  0xe4   : > { %1135 = vperm.xlu0 %3136, %v1131_v20   ;;  %1140 = vperm.xlu1 %3137, %v1132_v21  }
  0xe8   : > { %1685 = vrot.lane.b32.xlu1 %v2986_v26, %s3282_s26  ;;  %1600 = vrot.lane.b32.xlu0 %v2979_v29, %s3281_s24 }
 0x12a   : > { %v476_v31 = vpop.permute.xlu1 %475 }
 0x12e   : > { %v654_v32 = vpop.permute.xlu1 %653  ;;  %v564_v33 = vpop.permute.xlu0 %563 }
 0x132   : > { %v903_v34 = vpop.permute.xlu1 %902  ;;  %v815_v35 = vpop.permute.xlu0 %814 }
 0x136   : > { %v474_v36 = vpop.permute.xlu0 %473  ;;  %v472_v38 = vpop.permute.xlu1 %471 }
 0x137   : > { %v479_v40 = vsel %vm477_vm2, %v474_v36, %v476_v31  ;;  %v478_v41 = vsel %vm477_vm2, %v472_v38, %v474_v36 }
 0x138   : > { %2883 = vmatprep.subr.msk.bf16.mxu1 %vm4091_vm1, %v479_v40  ;;  %v484_v42 = vsel %vm4091_vm1, %v478_v41, 0 }
 0x139   : > { %504 = vmatpush1.bf16.msra.mxu1 %v484_v42 }
 0x13a   : > { %v560_v44 = vpop.permute.xlu0 %559  ;;  %v562_v46 = vpop.permute.xlu1 %561 }
 0x13b   : > { %v566_v47 = vsel %vm565_vm5, %v560_v44, %v562_v46  ;;  %v567_v48 = vsel %vm565_vm5, %v562_v46, %v564_v33 }
 0x13c   : > { %v572_v49 = vsel %vm4091_vm1, %v566_v47, 0  ;;  %2884 = vmatmul.mubr.msk.bf16.vlgmr.msra.gmra.mxu1 %vm4090_vm4, %v3145_v43  ;;  %2891 = vmatprep.subr.msk.bf16.mxu0 %vm4091_vm1, %v567_v48 }
 0x13d   : > { %592 = vmatpush1.bf16.msra.mxu0 %v572_v49  ;;  %699 = vmatprep.mubr.bf16.mxu1 %v3279_v1 }
 0x13e   : > { %v652_v51 = vpop.permute.xlu0 %651  ;;  %v650_v52 = vpop.permute.xlu1 %649  ;;  %2906 = vmatprep.subr.msk.bf16.mxu0 %vm4091_vm1, %v3559_v62 }
 0x13f   : > { %v657_v54 = vsel %vm4089_vm3, %v652_v51, %v654_v32  ;;  %v656_v55 = vsel %vm4089_vm3, %v650_v52, %v652_v51  ;;  %vm984_vm3 = vcmask 916480   ;;  %v3152_v32 = vld [vmem:[%s4074_s1 + $0x40] sm:$0xff]  }
 0x140   : > { %v662_v56 = vsel %vm4091_vm1, %v656_v55, 0  ;;  %2892 = vmatmul.mubr.msk.bf16.vlgmr.msra.gmra.mxu0 %vm4090_vm4, %v3146_v50  ;;  %2899 = vmatprep.subr.msk.bf16.mxu1 %vm4091_vm1, %v657_v54 }
 0x141   : > { %682 = vmatpush1.bf16.msra.mxu1 %v662_v56  ;;  %752 = vmatpush1.bf16.msra.mxu0 %v732_v53 }
 0x142   : > { %v979_v59 = vpop.permute.xlu0 %978  ;;  %v981_v60 = vpop.permute.xlu1 %980  ;;  %769 = vmatprep.mubr.bf16.mxu0 %v3279_v1 }
 0x143   : > { %v985_v14 = vsel %vm984_vm3, %v979_v59, %v981_v60 }
 0x144   : > { %2900 = vmatmul.mubr.msk.bf16.vlgmr.msra.gmra.mxu1 %vm4090_vm4, %v3147_v58  ;;  %v991_v22 = vsel %vm4091_vm1, %v985_v14, 0 }
 0x145   : > { %859 = vmatprep.mubr.bf16.mxu1 %v3279_v1 }
 0x146   : > { %v811_v62 = vpop.permute.xlu0 %810  ;;  %v813_v0 = vpop.permute.xlu1 %812 }
 0x147   : > { %v816_v2 = vsel %vm627_vm14, %v811_v62, %v813_v0  ;;  %v817_v4 = vsel %vm627_vm14, %v813_v0, %v815_v35 }
 0x148   : > { %v822_v5 = vsel %vm4091_vm1, %v816_v2, 0  ;;  %2907 = vmatmul.mubr.msk.bf16.vlgmr.msra.gmra.mxu0 %vm4090_vm4, %v3148_v61  ;;  %2914 = vmatprep.subr.msk.bf16.mxu1 %vm4091_vm1, %v817_v4 }
 0x149   : > { %842 = vmatpush1.bf16.msra.mxu1 %v822_v5  ;;  %947 = vmatprep.mubr.bf16.mxu0 %v3279_v1 }
 0x14a   : > { %v901_v7 = vpop.permute.xlu0 %900  ;;  %v899_v8 = vpop.permute.xlu1 %898 }
 0x14b   : > { %v905_v9 = vsel %vm537_vm11, %v901_v7, %v903_v34  ;;  %v904_v11 = vsel %vm537_vm11, %v899_v8, %v901_v7 }
 0x14c   : > { %v910_v12 = vsel %vm4091_vm1, %v904_v11, 0  ;;  %2915 = vmatmul.mubr.msk.bf16.vlgmr.msra.gmra.mxu1 %vm4090_vm4, %v3149_v6  ;;  %2922 = vmatprep.subr.msk.bf16.mxu0 %vm4091_vm1, %v905_v9 }
 0x14d   : > { %930 = vmatpush1.bf16.msra.mxu0 %v910_v12  ;;  %1028 = vmatprep.mubr.bf16.mxu1 %v3279_v1 }
 0x14e   : > { %v983_v15 = vpop.permute.xlu0 %982  ;;  %v1068_v20 = vpop.permute.xlu1 %1067 }
 0x14f   : > { %v986_v21 = vsel %vm984_vm3, %v981_v60, %v983_v15 }
 0x150   : > { %2923 = vmatmul.mubr.msk.bf16.vlgmr.msra.gmra.mxu0 %vm4090_vm4, %v3150_v13  ;;  %2930 = vmatprep.subr.msk.bf16.mxu1 %vm4091_vm1, %v986_v21 }
 0x151   : > { %1011 = vmatpush1.bf16.msra.mxu1 %v991_v22  ;;  %1116 = vmatprep.mubr.bf16.mxu0 %v3279_v1 }
 0x152   : > { %v1070_v24 = vpop.permute.xlu0 %1069  ;;  %v1072_v25 = vpop.permute.xlu1 %1071 }
 0x153   : > { %v1073_v26 = vsel %vm4092_vm8, %v1068_v20, %v1070_v24  ;;  %v1074_v29 = vsel %vm4092_vm8, %v1070_v24, %v1072_v25  ;;  %vm4118_vm8 = vcmp.ne.s16.totalorder %v3528_v45, 0 }
 0x154   : > { %v1079_v31 = vsel %vm4091_vm1, %v1073_v26, 0  ;;  %2931 = vmatmul.mubr.msk.bf16.vlgmr.msra.gmra.mxu1 %vm4090_vm4, %v3151_v23  ;;  %2938 = vmatprep.subr.msk.bf16.mxu0 %vm4091_vm1, %v1074_v29 }
 0x155   : > { %1099 = vmatpush1.bf16.msra.mxu0 %v1079_v31  ;;  %1242 = vmatprep.mubr.bf16.mxu1 %v3279_v1 }
 0x158   : > { %2939 = vmatmul.mubr.msk.bf16.vlgmr.msra.gmra.mxu0 %vm4090_vm4, %v3152_v32  ;;  %vm4114_vm4 = vcmp.ne.s16.totalorder %v3499_v30, 0 }
 0x159   : > { %1316 = vmatprep.mubr.bf16.mxu0 %v3279_v1  ;;  %vm4115_vm1 = vmmov %vm4114_vm4 }
 0x189   : > { %v449_v33 = vpop.f32.mrf.mxu0 }
 0x18b   : > { %v451_v34 = vpop.f32.mrf.mxu0 }
 0x18d   : > { %v453_v35 = vpop.f32.mrf.mxu0 }
 0x18f   : > { %v455_v38 = vpop.f32.mrf.mxu0 }
 0x1fc   : > { %v523_v36 = vpop.f32.mrf.mxu1 }
 0x1fd   : > { %v524_v54 = vadd.f32 %v523_v36, %v449_v33 }
 0x1fe   : > { %v525_v40 = vpop.f32.mrf.mxu1 }
 0x1ff   : > { %v526_v58 = vadd.f32 %v525_v40, %v451_v34  ;;  %v1136_v40 = vpop.permute.xlu0 %1135 }
 0x200   : > { %v527_v41 = vpop.f32.mrf.mxu1  ;;  %v611_v42 = vpop.f32.mrf.mxu0 }
 0x201   : > { %v620_v59 = vadd.f32 %v611_v42, %v524_v54  ;;  %v528_v62 = vadd.f32 %v527_v41, %v453_v35 }
 0x202   : > { %v529_v43 = vpop.f32.mrf.mxu1  ;;  %v613_v44 = vpop.f32.mrf.mxu0 }
 0x203   : > { %v621_v0 = vadd.f32 %v613_v44, %v526_v58  ;;  %v530_v6 = vadd.f32 %v529_v43, %v455_v38 }
 0x204   : > { %v615_v46 = vpop.f32.mrf.mxu0  ;;  %v701_v47 = vpop.f32.mrf.mxu1 }
 0x205   : > { %v710_v2 = vadd.f32 %v701_v47, %v620_v59  ;;  %v622_v7 = vadd.f32 %v615_v46, %v528_v62 }
 0x206   : > { %v617_v48 = vpop.f32.mrf.mxu0  ;;  %v703_v49 = vpop.f32.mrf.mxu1 }
 0x207   : > { %v711_v8 = vadd.f32 %v703_v49, %v621_v0  ;;  %v623_v13 = vadd.f32 %v617_v48, %v530_v6 }
 0x208   : > { %v705_v50 = vpop.f32.mrf.mxu1  ;;  %v771_v51 = vpop.f32.mrf.mxu0 }
 0x209   : > { %v780_v9 = vadd.f32 %v771_v51, %v710_v2  ;;  %v712_v14 = vadd.f32 %v705_v50, %v622_v7 }
 0x20a   : > { %v707_v52 = vpop.f32.mrf.mxu1  ;;  %v773_v53 = vpop.f32.mrf.mxu0 }
 0x20b   : > { %v781_v15 = vadd.f32 %v773_v53, %v711_v8  ;;  %v713_v23 = vadd.f32 %v707_v52, %v623_v13 }
 0x20c   : > { %v775_v55 = vpop.f32.mrf.mxu0  ;;  %v861_v56 = vpop.f32.mrf.mxu1 }
 0x20d   : > { %v870_v20 = vadd.f32 %v861_v56, %v780_v9  ;;  %v782_v24 = vadd.f32 %v775_v55, %v712_v14  ;;  %v1141_v56 = vpop.permute.xlu1 %1140 }
 0x20e   : > { %v777_v60 = vpop.f32.mrf.mxu0  ;;  %v863_v61 = vpop.f32.mrf.mxu1 }
 0x20f   : > { %v871_v25 = vadd.f32 %v863_v61, %v781_v15  ;;  %v783_v32 = vadd.f32 %v777_v60, %v713_v23 }
 0x210   : > { %v865_v4 = vpop.f32.mrf.mxu1  ;;  %v949_v5 = vpop.f32.mrf.mxu0 }
 0x211   : > { %v958_v26 = vadd.f32 %v949_v5, %v870_v20  ;;  %v872_v33 = vadd.f32 %v865_v4, %v782_v24 }
 0x212   : > { %v867_v11 = vpop.f32.mrf.mxu1  ;;  %v951_v12 = vpop.f32.mrf.mxu0 }
 0x213   : > { %v959_v34 = vadd.f32 %v951_v12, %v871_v25  ;;  %v873_v41 = vadd.f32 %v867_v11, %v783_v32 }
 0x214   : > { %v953_v21 = vpop.f32.mrf.mxu0  ;;  %v1030_v22 = vpop.f32.mrf.mxu1 }
 0x215   : > { %v1039_v35 = vadd.f32 %v1030_v22, %v958_v26  ;;  %v960_v42 = vadd.f32 %v953_v21, %v872_v33 }
 0x216   : > { %v955_v29 = vpop.f32.mrf.mxu0  ;;  %v1032_v31 = vpop.f32.mrf.mxu1 }
 0x217   : > { %v1040_v43 = vadd.f32 %v1032_v31, %v959_v34  ;;  %v961_v48 = vadd.f32 %v955_v29, %v873_v41 }
 0x218   : > { %v1034_v36 = vpop.f32.mrf.mxu1  ;;  %v1118_v38 = vpop.f32.mrf.mxu0 }
 0x219   : > { %v1127_v44 = vadd.f32 %v1118_v38, %v1039_v35  ;;  %v1041_v49 = vadd.f32 %v1034_v36, %v960_v42 }
 0x21a   : > { %v1036_v46 = vpop.f32.mrf.mxu1  ;;  %v1120_v47 = vpop.f32.mrf.mxu0 }
 0x21b   : > { %v3694_v50 = vadd.f32 %v1136_v40, %v1127_v44  ;;  %v1128_v51 = vadd.f32 %v1120_v47, %v1040_v43  ;;  %v1042_v53 = vadd.f32 %v1036_v46, %v961_v48  ;;  %v2993_v47 = vcombine.low %v3598_v16, %v3600_v19 }
 0x21c   : > { %v1122_v52 = vpop.f32.mrf.mxu0 }
 0x21d   : > { %v3696_v54 = vadd.f32 %v1136_v40, %v1128_v51  ;;  %v1129_v55 = vadd.f32 %v1122_v52, %v1041_v49  ;;  %v1147_v59 = vmax.f32 %v3694_v50, 0.0  ;;  %v3779_v50 = vld [vmem:[#allocation3 + $0xc] sm:$0xf] }
 0x21e   : > { %v1124_v58 = vpop.f32.mrf.mxu0 }
 0x21f   : > { %v1148_v60 = vmax.f32 %v3696_v54, 0.0  ;;  %v3700_v61 = vadd.f32 %v1141_v56, %v1129_v55  ;;  %v1130_v62 = vadd.f32 %v1124_v58, %v1042_v53 }
 0x221   : > { %v3704_v0 = vpack.c.bf16 %v1148_v60, %v1147_v59  ;;  %v1146_v2 = vadd.f32 %v1141_v56, %v1130_v62  ;;  %v1149_v4 = vmax.f32 %v3700_v61, 0.0 }
 0x223   : > { %1163 = vst [vmem:[#allocation2 + $0x4] sm:$0xff] %v3704_v0  ;;  %v1150_v5 = vmax.f32 %v1146_v2, 0.0  ;;  %v1656_v52 = vsel %vm878_vm0, %v3704_v0, 0  ;;  %v1822_v61 = vsel %vm1047_vm15, %v3704_v0, 0  ;;  %v3181_v62 = vpack.c.bf16 %v1149_v4, %v1147_v59  ;;  %v3781_v59 = vld [vmem:[#allocation3 + $0x1c] sm:$0xf] }
 0x225   : > { %v3076_v6 = vpack.c.bf16 %v1150_v5, %v1149_v4  ;;  %v3180_v55 = vpack.c.bf16 %v1150_v5, %v1148_v60  ;;  %v1823_v60 = vsel %vm3583_vm12, %v3598_v16, 0  ;;  %v1825_v5 = vsel %vm3583_vm12, %v3600_v19, 0  ;;  %v1907_v16 = vld [vmem:[%s4077_s4] sm:$0xff]  ;;  %v1908_v19 = vld [vmem:[%s4077_s4 + $0x8] sm:$0xff] }
 0x226   : > { %v2434_v4 = vsel %vm3509_vm13, %v3781_v59, 0 }
 0x227   : > { %1164 = vst [vmem:[#allocation2 + $0x14] sm:$0xff] %v3076_v6  ;;  %v1658_v51 = vsel %vm878_vm0, %v3076_v6, 0  ;;  %v1824_v58 = vsel %vm1047_vm15, %v3076_v6, 0 }
 0x228   : > { %v2985_v54 = vcombine.high %v1656_v52, %v1658_v51  ;;  %v2984_v56 = vcombine.low %v1656_v52, %v1658_v51  ;;  %v2999_v2 = vcombine.high %v1822_v61, %v1824_v58  ;;  %v3160_v51 = vld [vmem:[%s4076_s3 + $0x20] sm:$0xff]  }
 0x22a   : > { %v1166_v7 = vld [vmem:[#allocation2 + $0x8] sm:$0xf]  ;;  %v1165_v9 = vld [vmem:[#allocation2] sm:$0xff] }
 0x22b   : > { %v1169_v15 = vsel %vm4115_vm1, %v1165_v9, 0  ;;  %v1170_v23 = vsel %vm3474_vm6, %v1166_v7, 0  ;;  %v1328_v32 = vsel %vm3489_vm9, %v1166_v7, 0  ;;  %v1413_v42 = vsel %vm3478_vm7, %v1166_v7, 0 }
 0x22e   : > { %v1168_v8 = vld [vmem:[#allocation2 + $0x18] sm:$0xf]  ;;  %v1167_v11 = vld [vmem:[#allocation2 + $0x10] sm:$0xff] }
 0x22f   : > { %v2947_v12 = vcombine.low %v1166_v7, %v1168_v8  ;;  %v2946_v13 = vcombine.high %v1165_v9, %v1167_v11  ;;  %v1171_v14 = vsel %vm4114_vm4, %v1167_v11, 0  ;;  %v2945_v20 = vcombine.low %v1165_v9, %v1167_v11 }
 0x230   : > { %v2951_v21 = vcombine.high %v1169_v15, %v1171_v14  ;;  %v1172_v22 = vsel %vm3474_vm6, %v1168_v8, 0  ;;  %v2950_v25 = vcombine.low %v1169_v15, %v1171_v14  ;;  %vm4116_vm4 = vcmp.ne.s16.totalorder %v3516_v39, 0  ;;  %v1601_v14 = vpop.permute.xlu0 %1600 }
 0x231   : > { %1200 = vrot.lane.b32.xlu0 %v2947_v12, %s3286_s23  ;;  %1198 = vrot.lane.b32.xlu1 %v2946_v13, %s3286_s23  ;;  %v2952_v24 = vcombine.low %v1170_v23, %v1172_v22  ;;  %v1329_v26 = vsel %vm4116_vm4, %v1167_v11, 0  ;;  %v1330_v29 = vsel %vm3489_vm9, %v1168_v8, 0  ;;  %vm4117_vm1 = vmmov %vm4116_vm4  ;;  %v1414_v35 = vsel %vm4118_vm8, %v1167_v11, 0  ;;  %v1686_v13 = vpop.permute.xlu1 %1685  ;;  %v3156_v23 = vld [vmem:[%s4076_s3 + $0x8] sm:$0xff]  }
 0x232   : > { %v1327_v31 = vsel %vm4117_vm1, %v1165_v9, 0  ;;  %v2959_v34 = vcombine.low %v1328_v32, %v1330_v29  ;;  %vm4119_vm4 = vmmov %vm4118_vm8  ;;  %v1415_v41 = vsel %vm3478_vm7, %v1168_v8, 0  ;;  %vm4120_vm8 = vcmp.ne.s16.totalorder %v3549_v57, 0 }
 0x233   : > { %v2958_v33 = vcombine.high %v1327_v31, %v1329_v26  ;;  %v1412_v36 = vsel %vm4119_vm4, %v1165_v9, 0  ;;  %v2957_v38 = vcombine.low %v1327_v31, %v1329_v26  ;;  %v2966_v43 = vcombine.low %v1413_v42, %v1415_v41  ;;  %vm4121_vm1 = vmmov %vm4120_vm8  ;;  %v3157_v31 = vld [vmem:[%s4076_s3] sm:$0xff]  }
 0x234   : > { %v2965_v40 = vcombine.high %v1412_v36, %v1414_v35  ;;  %v2964_v44 = vcombine.low %v1412_v36, %v1414_v35  ;;  %v1573_v46 = vsel %vm4120_vm8, %v3076_v6, 0  ;;  %v1571_v48 = vsel %vm4121_vm1, %v3704_v0, 0 }
 0x235   : > { %1196 = vrot.lane.b32.xlu1 %v2945_v20, %s3286_s23  ;;  %1273 = vrot.lane.b32.xlu0 %v2951_v21, %s3285_s22  ;;  %v2978_v49 = vcombine.high %v1571_v48, %v1573_v46  ;;  %v2977_v53 = vcombine.low %v1571_v48, %v1573_v46  ;;  %v3000_v6 = vcombine.low %v1823_v60, %v1825_v5  ;;  %v2432_v0 = vsel %vm3509_vm13, %v3779_v50, 0  ;;  %v3159_v46 = vld [vmem:[%s4076_s3 + $0x18] sm:$0xff]   ;;  %v3162_v60 = vld [vmem:[%s4076_s3 + $0x30] sm:$0xff]  }
 0x236   : > { %v2998_v7 = vcombine.low %v1822_v61, %v1824_v58  ;;  %v2347_v8 = vsel %vm3493_vm10, %v3779_v50, 0  ;;  %v2349_v9 = vsel %vm3493_vm10, %v3781_v59, 0  ;;  %v3048_v11 = vcombine.low %v2432_v0, %v2434_v4 }
 0x237   : > { %v3041_v12 = vcombine.low %v2347_v8, %v2349_v9  ;;  %vm4122_vm13 = vcmask 130048   ;;  %vm4126_vm1 = vcmask 7168   ;;  %v3164_v9 = vld [vmem:[%s4076_s3 + $0x40] sm:$0xff]  }
 0x238   : > { %vm4123_vm4 = vmmov %vm4122_vm13 }
 0x239   : > { %1275 = vrot.lane.b32.xlu1 %v2952_v24, %s3285_s22  ;;  %1271 = vrot.lane.b32.xlu0 %v2950_v25, %s3285_s22  ;;  %vm4124_vm10 = vmmov %vm4123_vm4 }
 0x23a   : > { %vm4125_vm8 = vmmov %vm4123_vm4 }
 0x23d   : > { %1354 = vrot.lane.b32.xlu1 %v2958_v33, %s3284_s12  ;;  %1356 = vrot.lane.b32.xlu0 %v2959_v34, %s3284_s12 }
 0x241   : > { %1352 = vrot.lane.b32.xlu1 %v2957_v38, %s3284_s12  ;;  %1439 = vrot.lane.b32.xlu0 %v2965_v40, %s3283_s10  ;;  %v3158_v40 = vld [vmem:[%s4076_s3 + $0x10] sm:$0xff]  }
 0x245   : > { %1441 = vrot.lane.b32.xlu1 %v2966_v43, %s3283_s10  ;;  %1437 = vrot.lane.b32.xlu0 %v2964_v44, %s3283_s10 }
 0x249   : > { %1598 = vrot.lane.b32.xlu1 %v2978_v49, %s3281_s24  ;;  %1766 = vrot.lane.b32.xlu0 %v2993_v47, %s3287_s20 }
 0x24d   : > { %1596 = vrot.lane.b32.xlu1 %v2977_v53, %s3281_s24  ;;  %1683 = vrot.lane.b32.xlu0 %v2985_v54, %s3282_s26 }
 0x251   : > { %1764 = vrot.lane.b32.xlu1 %v3180_v55, %s3287_s20  ;;  %1681 = vrot.lane.b32.xlu0 %v2984_v56, %s3282_s26  ;;  %v3161_v56 = vld [vmem:[%s4076_s3 + $0x28] sm:$0xff]  }
 0x255   : > { %1762 = vrot.lane.b32.xlu1 %v3181_v62, %s3287_s20  ;;  %1849 = vrot.lane.b32.xlu0 %v2999_v2, %s3280_s16 }
 0x259   : > { %1851 = vrot.lane.b32.xlu1 %v3000_v6, %s3280_s16  ;;  %1847 = vrot.lane.b32.xlu0 %v2998_v7, %s3280_s16 }
 0x25d   : > { %1911 = vperm.xlu1 %3137, %v1907_v16   ;;  %1916 = vperm.xlu0 %3136, %v1908_v19   ;;  %v3163_v16 = vld [vmem:[%s4076_s3 + $0x38] sm:$0xff]  }
 0x261   : > { %2460 = vrot.lane.b32.xlu1 %v3048_v11, %s3282_s26  ;;  %2375 = vrot.lane.b32.xlu0 %v3041_v12, %s3281_s24 }
 0x2a3   : > { %v1201_v37 = vpop.permute.xlu0 %1200  ;;  %v1199_v15 = vpop.permute.xlu1 %1198 }
 0x2a4   : > { %v1203_v20 = vsel %vm4122_vm13, %v1199_v15, %v1201_v37  ;;  %vm4127_vm13 = vmmov %vm4123_vm4 }
 0x2a5   : > { %1224 = vmatprep.subr.bf16.mxu1 %v1203_v20 }
 0x2a7   : > { %v1197_v21 = vpop.permute.xlu1 %1196  ;;  %v1274_v22 = vpop.permute.xlu0 %1273 }
 0x2a8   : > { %v1202_v28 = vsel %vm4123_vm4, %v1197_v21, %v1199_v15  ;;  %vm4128_vm4 = vmmov %vm4126_vm1 }
 0x2a9   : > { %1225 = vmatpush1.bf16.msra.mxu1 %v1202_v28 }
 0x2ab   : > { %v1276_v24 = vpop.permute.xlu1 %1275  ;;  %v1272_v25 = vpop.permute.xlu0 %1271 }
 0x2ac   : > { %v1277_v26 = vsel %vm477_vm2, %v1272_v25, %v1274_v22  ;;  %2948 = vmatmul.mubr.msk.bf16.vlgmr.msra.gmra.mxu1 %vm4124_vm10, %v3156_v23  ;;  %v1278_v29 = vsel %vm477_vm2, %v1274_v22, %v1276_v24  ;;  %vm4129_vm10 = vmmov %vm4125_vm8 }
 0x2ad   : > { %1298 = vmatprep.subr.bf16.mxu0 %v1278_v29  ;;  %1397 = vmatprep.mubr.bf16.mxu1 %v3279_v1 }
 0x2ae   : > { %1299 = vmatpush1.bf16.msra.mxu0 %v1277_v26 }
 0x2af   : > { %v1355_v32 = vpop.permute.xlu1 %1354  ;;  %v1357_v33 = vpop.permute.xlu0 %1356 }
 0x2b0   : > { %v1359_v34 = vsel %vm565_vm5, %v1355_v32, %v1357_v33 }
 0x2b1   : > { %2953 = vmatmul.mubr.msk.bf16.vlgmr.msra.gmra.mxu0 %vm4125_vm8, %v3157_v31  ;;  %1379 = vmatprep.subr.bf16.mxu1 %v1359_v34 }
 0x2b2   : > { %1482 = vmatprep.mubr.bf16.mxu0 %v3279_v1 }
 0x2b3   : > { %v1353_v35 = vpop.permute.xlu1 %1352  ;;  %v1440_v36 = vpop.permute.xlu0 %1439 }
 0x2b4   : > { %v1358_v38 = vsel %vm565_vm5, %v1353_v35, %v1355_v32 }
 0x2b5   : > { %1380 = vmatpush1.bf16.msra.mxu1 %v1358_v38 }
 0x2b6   : > { %1534 = vmatprep.subr.bf16.mxu1 %v3180_v55 }
 0x2b7   : > { %v1442_v41 = vpop.permute.xlu1 %1441  ;;  %v1438_v42 = vpop.permute.xlu0 %1437 }
 0x2b8   : > { %v1443_v43 = vsel %vm4126_vm1, %v1438_v42, %v1440_v36  ;;  %2960 = vmatmul.mubr.msk.bf16.vlgmr.msra.gmra.mxu1 %vm4127_vm13, %v3158_v40  ;;  %v1444_v44 = vsel %vm4128_vm4, %v1440_v36, %v1442_v41  ;;  %vm4130_vm1 = vmmov %vm4125_vm8  ;;  %vm4132_vm4 = vcmask 908288  }
 0x2b9   : > { %1464 = vmatprep.subr.bf16.mxu0 %v1444_v44  ;;  %1535 = vmatpush1.bf16.msra.mxu1 %v3181_v62  ;;  %vm4131_vm13 = vmmov %vm4130_vm1 }
 0x2ba   : > { %1465 = vmatpush1.bf16.msra.mxu0 %v1443_v43  ;;  %1552 = vmatprep.mubr.bf16.mxu1 %v3279_v1 }
 0x2bb   : > { %v1599_v47 = vpop.permute.xlu1 %1598  ;;  %v1767_v48 = vpop.permute.xlu0 %1766 }
 0x2bc   : > { %v1603_v49 = vsel %vm627_vm14, %v1599_v47, %v1601_v14 }
 0x2bd   : > { %2967 = vmatmul.mubr.msk.bf16.vlgmr.msra.gmra.mxu0 %vm4129_vm10, %v3159_v46  ;;  %1623 = vmatprep.subr.bf16.mxu0 %v1603_v49  ;;  %vm4133_vm10 = vmmov %vm4132_vm4 }
 0x2be   : > { %1641 = vmatprep.mubr.bf16.mxu0 %v3279_v1 }
 0x2bf   : > { %v1597_v52 = vpop.permute.xlu1 %1596  ;;  %v1684_v53 = vpop.permute.xlu0 %1683 }
 0x2c0   : > { %v1602_v54 = vsel %vm627_vm14, %v1597_v52, %v1599_v47  ;;  %2973 = vmatmul.mubr.msk.bf16.vlgmr.msra.gmra.mxu1 %vm4125_vm8, %v3160_v51  ;;  %v1688_v55 = vsel %vm537_vm11, %v1684_v53, %v1686_v13  ;;  %vm4134_vm8 = vmmov %vm4130_vm1 }
 0x2c1   : > { %1624 = vmatpush1.bf16.msra.mxu0 %v1602_v54  ;;  %1708 = vmatprep.subr.bf16.mxu1 %v1688_v55 }
 0x2c2   : > { %1726 = vmatprep.mubr.bf16.mxu1 %v3279_v1 }
 0x2c3   : > { %v1765_v58 = vpop.permute.xlu1 %1764  ;;  %v1682_v61 = vpop.permute.xlu0 %1681 }
 0x2c4   : > { %v1687_v62 = vsel %vm537_vm11, %v1682_v61, %v1684_v53  ;;  %v1769_v2 = vsel %vm984_vm3, %v1765_v58, %v1767_v48 }
 0x2c5   : > { %2980 = vmatmul.mubr.msk.bf16.vlgmr.msra.gmra.mxu0 %vm4130_vm1, %v3161_v56  ;;  %1709 = vmatpush1.bf16.msra.mxu1 %v1687_v62 }
 0x2c6   : > { %1789 = vmatprep.subr.bf16.mxu0 %v1769_v2  ;;  %1807 = vmatprep.mubr.bf16.mxu0 %v3279_v1 }
 0x2c7   : > { %v1763_v5 = vpop.permute.xlu1 %1762  ;;  %v1850_v6 = vpop.permute.xlu0 %1849 }
 0x2c8   : > { %v1768_v7 = vsel %vm984_vm3, %v1763_v5, %v1765_v58  ;;  %2987 = vmatmul.mubr.msk.bf16.vlgmr.msra.gmra.mxu1 %vm4131_vm13, %v3162_v60  ;;  %vm4135_vm13 = vcmp.ne.s16.totalorder %v3499_v30, 0 }
 0x2c9   : > { %1790 = vmatpush1.bf16.msra.mxu0 %v1768_v7  ;;  %1892 = vmatprep.mubr.bf16.mxu1 %v3279_v1 }
 0x2cb   : > { %v1852_v19 = vpop.permute.xlu1 %1851  ;;  %v1848_v0 = vpop.permute.xlu0 %1847 }
 0x2cc   : > { %v1853_v4 = vsel %vm4132_vm4, %v1848_v0, %v1850_v6  ;;  %v1854_v8 = vsel %vm4133_vm10, %v1850_v6, %v1852_v19  ;;  %vm4136_vm4 = vmmov %vm4135_vm13  ;;  %vm4137_vm10 = vcmp.ne.s16.totalorder %v3516_v39, 0 }
 0x2cd   : > { %2994 = vmatmul.mubr.msk.bf16.vlgmr.msra.gmra.mxu0 %vm4134_vm8, %v3163_v16  ;;  %1874 = vmatprep.subr.bf16.mxu1 %v1854_v8  ;;  %vm4138_vm8 = vmmov %vm4137_vm10 }
 0x2ce   : > { %1875 = vmatpush1.bf16.msra.mxu1 %v1853_v4  ;;  %2017 = vmatprep.mubr.bf16.mxu0 %v3279_v1 }
 0x2d1   : > { %3001 = vmatmul.mubr.msk.bf16.vlgmr.msra.gmra.mxu1 %vm4130_vm1, %v3164_v9 }
 0x2d2   : > { %2091 = vmatprep.mubr.bf16.mxu1 %v3279_v1 }
 0x36c   : > { %v1244_v11 = vpop.f32.mrf.mxu1 }
 0x36e   : > { %v1246_v12 = vpop.f32.mrf.mxu1 }
 0x370   : > { %v1248_v14 = vpop.f32.mrf.mxu1 }
 0x371   : > { %v1318_v13 = vpop.f32.mrf.mxu0 }
 0x372   : > { %v1250_v15 = vpop.f32.mrf.mxu1  ;;  %v1319_v29 = vadd.f32 %v1318_v13, %v1244_v11 }
 0x373   : > { %v1320_v37 = vpop.f32.mrf.mxu0 }
 0x374   : > { %v1321_v33 = vadd.f32 %v1320_v37, %v1246_v12  ;;  %v1912_v37 = vpop.permute.xlu1 %1911 }
 0x375   : > { %v1322_v20 = vpop.f32.mrf.mxu0 }
 0x376   : > { %v1323_v38 = vadd.f32 %v1322_v20, %v1248_v14 }
 0x377   : > { %v1324_v28 = vpop.f32.mrf.mxu0 }
 0x378   : > { %v1399_v21 = vpop.f32.mrf.mxu1  ;;  %v1325_v44 = vadd.f32 %v1324_v28, %v1250_v15  ;;  %v2461_v10 = vpop.permute.xlu1 %2460 }
 0x379   : > { %v1408_v34 = vadd.f32 %v1399_v21, %v1319_v29 }
 0x37a   : > { %v1401_v22 = vpop.f32.mrf.mxu1 }
 0x37b   : > { %v1409_v40 = vadd.f32 %v1401_v22, %v1321_v33 }
 0x37c   : > { %v1403_v23 = vpop.f32.mrf.mxu1 }
 0x37d   : > { %v1484_v24 = vpop.f32.mrf.mxu0  ;;  %v1410_v46 = vadd.f32 %v1403_v23, %v1323_v38 }
 0x37e   : > { %v1405_v25 = vpop.f32.mrf.mxu1  ;;  %v1493_v41 = vadd.f32 %v1484_v24, %v1408_v34  ;;  %v1917_v34 = vpop.permute.xlu0 %1916 }
 0x37f   : > { %v1486_v26 = vpop.f32.mrf.mxu0  ;;  %v1411_v51 = vadd.f32 %v1405_v25, %v1325_v44 }
 0x380   : > { %v1554_v31 = vpop.f32.mrf.mxu1  ;;  %v1494_v47 = vadd.f32 %v1486_v26, %v1409_v40 }
 0x381   : > { %v1488_v32 = vpop.f32.mrf.mxu0  ;;  %v1563_v52 = vadd.f32 %v1554_v31, %v1493_v41 }
 0x382   : > { %v1556_v35 = vpop.f32.mrf.mxu1  ;;  %v1495_v53 = vadd.f32 %v1488_v32, %v1410_v46 }
 0x383   : > { %v1490_v36 = vpop.f32.mrf.mxu0  ;;  %v1564_v56 = vadd.f32 %v1556_v35, %v1494_v47 }
 0x384   : > { %v1558_v42 = vpop.f32.mrf.mxu1  ;;  %v1496_v58 = vadd.f32 %v1490_v36, %v1411_v51 }
 0x385   : > { %v1643_v43 = vpop.f32.mrf.mxu0  ;;  %v1565_v60 = vadd.f32 %v1558_v42, %v1495_v53 }
 0x386   : > { %v1560_v48 = vpop.f32.mrf.mxu1  ;;  %v1652_v61 = vadd.f32 %v1643_v43, %v1563_v52 }
 0x387   : > { %v1645_v49 = vpop.f32.mrf.mxu0  ;;  %v1566_v16 = vadd.f32 %v1560_v48, %v1496_v58 }
 0x388   : > { %v1728_v54 = vpop.f32.mrf.mxu1  ;;  %v1653_v5 = vadd.f32 %v1645_v49, %v1564_v56 }
 0x389   : > { %v1647_v55 = vpop.f32.mrf.mxu0  ;;  %v1737_v19 = vadd.f32 %v1728_v54, %v1652_v61 }
 0x38a   : > { %v1730_v62 = vpop.f32.mrf.mxu1  ;;  %v1654_v0 = vadd.f32 %v1647_v55, %v1565_v60 }
 0x38b   : > { %v1649_v2 = vpop.f32.mrf.mxu0  ;;  %v1738_v9 = vadd.f32 %v1730_v62, %v1653_v5 }
 0x38c   : > { %v1732_v6 = vpop.f32.mrf.mxu1  ;;  %v1655_v11 = vadd.f32 %v1649_v2, %v1566_v16 }
 0x38d   : > { %v1809_v7 = vpop.f32.mrf.mxu0  ;;  %v1739_v15 = vadd.f32 %v1732_v6, %v1654_v0 }
 0x38e   : > { %v1734_v4 = vpop.f32.mrf.mxu1  ;;  %v1818_v12 = vadd.f32 %v1809_v7, %v1737_v19 }
 0x38f   : > { %v1811_v8 = vpop.f32.mrf.mxu0  ;;  %v1740_v23 = vadd.f32 %v1734_v4, %v1655_v11 }
 0x390   : > { %v1819_v20 = vadd.f32 %v1811_v8, %v1738_v9 }
 0x391   : > { %v1813_v13 = vpop.f32.mrf.mxu0  ;;  %v1894_v14 = vpop.f32.mrf.mxu1 }
 0x392   : > { %v1903_v21 = vadd.f32 %v1894_v14, %v1818_v12  ;;  %v1820_v24 = vadd.f32 %v1813_v13, %v1739_v15 }
 0x393   : > { %v1815_v22 = vpop.f32.mrf.mxu0  ;;  %v1896_v28 = vpop.f32.mrf.mxu1 }
 0x394   : > { %v3864_v25 = vadd.f32 %v1912_v37, %v1903_v21  ;;  %v1904_v26 = vadd.f32 %v1896_v28, %v1819_v20  ;;  %v1821_v31 = vadd.f32 %v1815_v22, %v1740_v23 }
 0x395   : > { %v1898_v29 = vpop.f32.mrf.mxu1 }
 0x396   : > { %v3866_v32 = vadd.f32 %v1912_v37, %v1904_v26  ;;  %v1905_v33 = vadd.f32 %v1898_v29, %v1820_v24  ;;  %v1923_v36 = vmax.f32 %v3864_v25, 0.0  ;;  %v2598_v26 = vsel %vm3583_vm12, %v3779_v50, 0 }
 0x397   : > { %v1900_v35 = vpop.f32.mrf.mxu1  ;;  %v2600_v29 = vsel %vm3583_vm12, %v3781_v59, 0 }
 0x398   : > { %v1924_v38 = vmax.f32 %v3866_v32, 0.0  ;;  %v3870_v40 = vadd.f32 %v1917_v34, %v1905_v33  ;;  %v1906_v41 = vadd.f32 %v1900_v35, %v1821_v31  ;;  %v3062_v31 = vcombine.low %v2598_v26, %v2600_v29 }
 0x39a   : > { %v3874_v42 = vpack.c.bf16 %v1924_v38, %v1923_v36  ;;  %v1922_v43 = vadd.f32 %v1917_v34, %v1906_v41  ;;  %v1925_v44 = vmax.f32 %v3870_v40, 0.0  ;;  %v3168_v40 = vld [vmem:[%s4078_s5 + $0x8] sm:$0xff]  }
 0x39c   : > { %1939 = vst [vmem:[#allocation3 + $0x4] sm:$0xff] %v3874_v42  ;;  %v1926_v46 = vmax.f32 %v1922_v43, 0.0  ;;  %v2431_v15 = vsel %vm878_vm0, %v3874_v42, 0  ;;  %v2597_v63 = vsel %vm1047_vm15, %v3874_v42, 0  ;;  %v3183_v23 = vpack.c.bf16 %v1925_v44, %v1923_v36 }
 0x39e   : > { %v3078_v47 = vpack.c.bf16 %v1926_v46, %v1925_v44 }
 0x3a0   : > { %1940 = vst [vmem:[#allocation3 + $0x14] sm:$0xff] %v3078_v47  ;;  %v2433_v18 = vsel %vm878_vm0, %v3078_v47, 0  ;;  %v2599_v28 = vsel %vm1047_vm15, %v3078_v47, 0 }
 0x3a1   : > { %v3047_v21 = vcombine.high %v2431_v15, %v2433_v18  ;;  %v3046_v22 = vcombine.low %v2431_v15, %v2433_v18  ;;  %v3061_v24 = vcombine.high %v2597_v63, %v2599_v28  ;;  %v3060_v32 = vcombine.low %v2597_v63, %v2599_v28  ;;  %v3179_v28 = vld [vmem:[%s4080_s7] sm:$0xff]  }
 0x3a3   : > { %v1942_v48 = vld [vmem:[#allocation3 + $0x8] sm:$0xf]  ;;  %v1941_v51 = vld [vmem:[#allocation3] sm:$0xff] }
 0x3a4   : > { %v1945_v56 = vsel %vm4136_vm4, %v1941_v51, 0  ;;  %v1946_v2 = vsel %vm3474_vm6, %v1942_v48, 0  ;;  %v2102_v7 = vsel %vm4138_vm8, %v1941_v51, 0  ;;  %v2103_v16 = vsel %vm3489_vm9, %v1942_v48, 0 }
 0x3a5   : > { %v2188_v27 = vsel %vm3478_vm7, %v1942_v48, 0 }
 0x3a7   : > { %v1944_v49 = vld [vmem:[#allocation3 + $0x18] sm:$0xf]  ;;  %v1943_v52 = vld [vmem:[#allocation3 + $0x10] sm:$0xff] }
 0x3a8   : > { %v3009_v53 = vcombine.low %v1942_v48, %v1944_v49  ;;  %v3008_v54 = vcombine.high %v1941_v51, %v1943_v52  ;;  %v1947_v55 = vsel %vm4135_vm13, %v1943_v52, 0  ;;  %v3007_v58 = vcombine.low %v1941_v51, %v1943_v52 }
 0x3a9   : > { %v3013_v61 = vcombine.high %v1945_v56, %v1947_v55  ;;  %v1948_v62 = vsel %vm3474_vm6, %v1944_v49, 0  ;;  %v3012_v5 = vcombine.low %v1945_v56, %v1947_v55  ;;  %v2104_v6 = vsel %vm4137_vm10, %v1943_v52, 0 }
 0x3aa   : > { %1976 = vrot.lane.b32.xlu0 %v3009_v53, %s3286_s23  ;;  %1974 = vrot.lane.b32.xlu1 %v3008_v54, %s3286_s23  ;;  %v3014_v60 = vcombine.low %v1946_v2, %v1948_v62  ;;  %v2105_v30 = vsel %vm3489_vm9, %v1944_v49, 0  ;;  %v3020_v17 = vcombine.high %v2102_v7, %v2104_v6  ;;  %vm4139_vm6 = vcmp.ne.s16.totalorder %v3528_v45, 0  ;;  %v3170_v54 = vld [vmem:[%s4078_s5 + $0x10] sm:$0xff]   ;;  %v3171_v62 = vld [vmem:[%s4078_s5 + $0x18] sm:$0xff]  }
 0x3ab   : > { %v3021_v19 = vcombine.low %v2103_v16, %v2105_v30  ;;  %v2189_v0 = vsel %vm4139_vm6, %v1943_v52, 0  ;;  %vm4140_vm1 = vmmov %vm4139_vm6  ;;  %v3019_v8 = vcombine.low %v2102_v7, %v2104_v6  ;;  %v2190_v39 = vsel %vm3478_vm7, %v1944_v49, 0  ;;  %v3172_v6 = vld [vmem:[%s4078_s5 + $0x20] sm:$0xff]  }
 0x3ac   : > { %v2187_v4 = vsel %vm4140_vm1, %v1941_v51, 0  ;;  %v3028_v11 = vcombine.low %v2188_v27, %v2190_v39  ;;  %vm4141_vm9 = vcmp.ne.s16.totalorder %v3549_v57, 0  ;;  %v3055_v45 = vcombine.low %v3779_v50, %v3781_v59  ;;  %v2683_v50 = vld [vmem:[%s4079_s6 + $0x8] sm:$0xff]  ;;  %v2376_v59 = vpop.permute.xlu0 %2375  ;;  %v3174_v27 = vld [vmem:[%s4078_s5 + $0x30] sm:$0xff]  }
 0x3ad   : > { %v3027_v9 = vcombine.high %v2187_v4, %v2189_v0  ;;  %v3026_v12 = vcombine.low %v2187_v4, %v2189_v0  ;;  %v2348_v13 = vsel %vm4141_vm9, %v3078_v47, 0  ;;  %vm4142_vm13 = vmmov %vm4141_vm9  ;;  %v3182_v57 = vpack.c.bf16 %v1926_v46, %v1924_v38  ;;  %v3169_v46 = vld [vmem:[%s4078_s5] sm:$0xff]  }
 0x3ae   : > { %1972 = vrot.lane.b32.xlu1 %v3007_v58, %s3286_s23  ;;  %2048 = vrot.lane.b32.xlu0 %v3013_v61, %s3285_s22  ;;  %v2346_v14 = vsel %vm4142_vm13, %v3874_v42, 0  ;;  %vm4143_vm7 = vcmask 130048   ;;  %vm4156_vm9 = vcmask 908288  }
 0x3af   : > { %v3040_v37 = vcombine.high %v2346_v14, %v2348_v13  ;;  %v3039_v20 = vcombine.low %v2346_v14, %v2348_v13  ;;  %vm4144_vm12 = vmmov %vm4143_vm7 }
 0x3b0   : > { %vm4145_vm15 = vmmov %vm4143_vm7 }
 0x3b1   : > { %vm4146_vm0 = vmmov %vm4143_vm7 }
 0x3b2   : > { %2050 = vrot.lane.b32.xlu1 %v3014_v60, %s3285_s22  ;;  %2046 = vrot.lane.b32.xlu0 %v3012_v5, %s3285_s22  ;;  %vm4148_vm4 = vmmov %vm4146_vm0 }
 0x3b3   : > { %vm4151_vm8 = vmmov %vm4146_vm0 }
 0x3b4   : > { %vm4153_vm6 = vmmov %vm4146_vm0 }
 0x3b5   : > { %vm4157_vm13 = vmmov %vm4156_vm9 }
 0x3b6   : > { %2129 = vrot.lane.b32.xlu1 %v3020_v17, %s3284_s12  ;;  %2131 = vrot.lane.b32.xlu0 %v3021_v19, %s3284_s12  ;;  %v3173_v19 = vld [vmem:[%s4078_s5 + $0x28] sm:$0xff]  }
 0x3ba   : > { %2127 = vrot.lane.b32.xlu1 %v3019_v8, %s3284_s12  ;;  %2214 = vrot.lane.b32.xlu0 %v3027_v9, %s3283_s10  ;;  %v2698_v8 = vld [vmem:[%s3437_s15 + $0x4] sm:$0xff] }
 0x3be   : > { %2216 = vrot.lane.b32.xlu1 %v3028_v11, %s3283_s10  ;;  %2212 = vrot.lane.b32.xlu0 %v3026_v12, %s3283_s10  ;;  %v3066_v11 = vcombine.high %v2698_v8, %v2698_v8 }
 0x3c2   : > { %2373 = vrot.lane.b32.xlu1 %v3040_v37, %s3281_s24  ;;  %2541 = vrot.lane.b32.xlu0 %v3055_v45, %s3287_s20  ;;  %v3065_v45 = vcombine.low %v2698_v8, %v2698_v8  ;;  %v3175_v37 = vld [vmem:[%s4078_s5 + $0x38] sm:$0xff]  }
 0x3c6   : > { %2371 = vrot.lane.b32.xlu1 %v3039_v20, %s3281_s24  ;;  %2458 = vrot.lane.b32.xlu0 %v3047_v21, %s3282_s26 }
 0x3ca   : > { %2539 = vrot.lane.b32.xlu1 %v3182_v57, %s3287_s20  ;;  %2456 = vrot.lane.b32.xlu0 %v3046_v22, %s3282_s26  ;;  %v3176_v22 = vld [vmem:[%s4078_s5 + $0x40] sm:$0xff]   ;;  %s2870_s26 = sshll.u32 %s3433_s13, 5 }
 0x3cb   : > { %s321_s10 = scalar_lea.vmem [#allocation7], %s2870_s26 }
 0x3cc   : > { %s2789_s12 = sshll.u32 %s321_s10, 4  ;;  %s4024_s12 = int_to_ptr.vmem [resolvable:$true] %s2789_s12 }
 0x3cd   : > { %s3212_s25 = scalar_lea.vmem %s4024_s12, 512 }
 0x3ce   : > { %2537 = vrot.lane.b32.xlu1 %v3183_v23, %s3287_s20  ;;  %2624 = vrot.lane.b32.xlu0 %v3061_v24, %s3280_s16  ;;  %p3213_p11 = scmp.ne.s32.totalorder %s4024_s12, %s3212_s25 }
 0x3d0   : > { %p3214_p13 = pnand %p3213_p11, %p4161_p12 }
 0x3d2   : > { %2626 = vrot.lane.b32.xlu1 %v3062_v31, %s3280_s16  ;;  %2622 = vrot.lane.b32.xlu0 %v3060_v32, %s3280_s16  ;;  %s3079_s16 = sshll.u32 %s3356_s9, 9  ;;  %p3215_p1 = pneg %p3214_p13 }
 0x3d3   : > { %s4029_s15 = scalar_lea.hbm %s4081_s8, %s3079_s16  ;;  %s3288_s9 = smov [#allocation7]  }
 0x3d4   : > { %s3216_s14 = sshll.u32 %s3288_s9, 4  ;;  %s3217_s14 = int_to_ptr.vmem [resolvable:$false] %s3216_s14 }
 0x3d5   : > { %s3218_s21 = scalar_lea.vmem %s3217_s14, 1024  ;;  %p3219_p3 = scmp.lt.s32.totalorder %s4024_s12, %s3217_s14 }
 0x3d6   : > { %2686 = vperm.xlu1 %3137, %v2682_v3   ;;  %2691 = vperm.xlu0 %3136, %v2683_v50   ;;  %p3220_p5 = scmp.lt.s32.totalorder %s3218_s21, %s3212_s25 }
 0x3d8   : > { %p3221_p8 = por %p3220_p5, %p3219_p3 }
 0x3da   : > { %p3222_p10 = pnand %p3221_p8, %p3215_p1 }
 0x41c   : > { %v1975_v25 = vpop.permute.xlu1 %1974  ;;  %v1977_v33 = vpop.permute.xlu0 %1976 }
 0x41d   : > { %v1979_v34 = vsel %vm4143_vm7, %v1975_v25, %v1977_v33  ;;  %vm4159_vm7 = vmmov %vm4146_vm0 }
 0x41e   : > { %1999 = vmatprep.subr.bf16.mxu0 %v1979_v34 }
 0x420   : > { %v1973_v35 = vpop.permute.xlu1 %1972  ;;  %v2049_v36 = vpop.permute.xlu0 %2048 }
 0x421   : > { %v1978_v38 = vsel %vm4144_vm12, %v1973_v35, %v1975_v25  ;;  %vm4160_vm12 = vcmask 64512  }
 0x422   : > { %2000 = vmatpush1.bf16.msra.mxu0 %v1978_v38 }
 0x424   : > { %v2051_v41 = vpop.permute.xlu1 %2050  ;;  %v2047_v42 = vpop.permute.xlu0 %2046 }
 0x425   : > { %v2052_v43 = vsel %vm477_vm2, %v2047_v42, %v2049_v36  ;;  %v2053_v44 = vsel %vm477_vm2, %v2049_v36, %v2051_v41  ;;  %3010 = vmatmul.mubr.msk.bf16.vlgmr.msra.gmra.mxu0 %vm4145_vm15, %v3168_v40  ;;  %vm4147_vm2 = vcmask 7168  }
 0x426   : > { %2073 = vmatprep.subr.bf16.mxu1 %v2053_v44  ;;  %2172 = vmatprep.mubr.bf16.mxu0 %v3279_v1  ;;  %vm4149_vm10 = vmmov %vm4147_vm2 }
 0x427   : > { %2074 = vmatpush1.bf16.msra.mxu1 %v2052_v43 }
 0x428   : > { %v2130_v47 = vpop.permute.xlu1 %2129  ;;  %v2132_v48 = vpop.permute.xlu0 %2131 }
 0x429   : > { %v2134_v49 = vsel %vm565_vm5, %v2130_v47, %v2132_v48 }
 0x42a   : > { %3015 = vmatmul.mubr.msk.bf16.vlgmr.msra.gmra.mxu1 %vm4146_vm0, %v3169_v46  ;;  %2154 = vmatprep.subr.bf16.mxu0 %v2134_v49 }
 0x42b   : > { %2257 = vmatprep.mubr.bf16.mxu1 %v3279_v1 }
 0x42c   : > { %v2128_v51 = vpop.permute.xlu1 %2127  ;;  %v2215_v52 = vpop.permute.xlu0 %2214 }
 0x42d   : > { %v2133_v53 = vsel %vm565_vm5, %v2128_v51, %v2130_v47  ;;  %vm4150_vm5 = vmmov %vm4146_vm0 }
 0x42e   : > { %2155 = vmatpush1.bf16.msra.mxu0 %v2133_v53 }
 0x42f   : > { %2309 = vmatprep.subr.bf16.mxu0 %v3182_v57 }
 0x430   : > { %v2217_v55 = vpop.permute.xlu1 %2216  ;;  %v2213_v56 = vpop.permute.xlu0 %2212 }
 0x431   : > { %v2218_v58 = vsel %vm4147_vm2, %v2213_v56, %v2215_v52  ;;  %3022 = vmatmul.mubr.msk.bf16.vlgmr.msra.gmra.mxu0 %vm4148_vm4, %v3170_v54  ;;  %v2219_v61 = vsel %vm4149_vm10, %v2215_v52, %v2217_v55 }
 0x432   : > { %2239 = vmatprep.subr.bf16.mxu1 %v2219_v61  ;;  %2310 = vmatpush1.bf16.msra.mxu0 %v3183_v23 }
 0x433   : > { %2240 = vmatpush1.bf16.msra.mxu1 %v2218_v58  ;;  %2327 = vmatprep.mubr.bf16.mxu0 %v3279_v1 }
 0x434   : > { %v2374_v2 = vpop.permute.xlu1 %2373  ;;  %v2542_v60 = vpop.permute.xlu0 %2541 }
 0x435   : > { %v2378_v5 = vsel %vm627_vm14, %v2374_v2, %v2376_v59 }
 0x436   : > { %3029 = vmatmul.mubr.msk.bf16.vlgmr.msra.gmra.mxu1 %vm4150_vm5, %v3171_v62  ;;  %2398 = vmatprep.subr.bf16.mxu1 %v2378_v5 }
 0x437   : > { %2416 = vmatprep.mubr.bf16.mxu1 %v3279_v1 }
 0x438   : > { %v2372_v30 = vpop.permute.xlu1 %2371  ;;  %v2459_v7 = vpop.permute.xlu0 %2458 }
 0x439   : > { %v2377_v16 = vsel %vm627_vm14, %v2372_v30, %v2374_v2  ;;  %3035 = vmatmul.mubr.msk.bf16.vlgmr.msra.gmra.mxu0 %vm4151_vm8, %v3172_v6  ;;  %v2463_v17 = vsel %vm537_vm11, %v2459_v7, %v2461_v10  ;;  %vm4152_vm14 = vmmov %vm4146_vm0 }
 0x43a   : > { %2399 = vmatpush1.bf16.msra.mxu1 %v2377_v16  ;;  %2483 = vmatprep.subr.bf16.mxu0 %v2463_v17 }
 0x43b   : > { %2501 = vmatprep.mubr.bf16.mxu0 %v3279_v1 }
 0x43c   : > { %v2540_v0 = vpop.permute.xlu1 %2539  ;;  %v2457_v4 = vpop.permute.xlu0 %2456 }
 0x43d   : > { %v2462_v9 = vsel %vm537_vm11, %v2457_v4, %v2459_v7  ;;  %v2544_v39 = vsel %vm984_vm3, %v2540_v0, %v2542_v60  ;;  %vm4154_vm11 = vcmask 1043456  }
 0x43e   : > { %3042 = vmatmul.mubr.msk.bf16.vlgmr.msra.gmra.mxu1 %vm4152_vm14, %v3173_v19  ;;  %2484 = vmatpush1.bf16.msra.mxu0 %v2462_v9  ;;  %vm4155_vm1 = vmmov %vm4154_vm11 }
 0x43f   : > { %2564 = vmatprep.subr.bf16.mxu1 %v2544_v39  ;;  %2582 = vmatprep.mubr.bf16.mxu1 %v3279_v1  ;;  %v2715_v20 = vsel %vm4155_vm1, %v3065_v45, 0 }
 0x440   : > { %v2538_v12 = vpop.permute.xlu1 %2537  ;;  %v2625_v13 = vpop.permute.xlu0 %2624 }
 0x441   : > { %v2543_v14 = vsel %vm984_vm3, %v2538_v12, %v2540_v0  ;;  %3049 = vmatmul.mubr.msk.bf16.vlgmr.msra.gmra.mxu0 %vm4153_vm6, %v3174_v27  ;;  %vm4158_vm3 = vmmov %vm4146_vm0 }
 0x442   : > { %2565 = vmatpush1.bf16.msra.mxu1 %v2543_v14  ;;  %2667 = vmatprep.mubr.bf16.mxu0 %v3279_v1 }
 0x443   : > { %3067 = vmatprep.subr.msk.bf16.mxu1 %vm4154_vm11, %v3066_v11 }
 0x444   : > { %v2627_v18 = vpop.permute.xlu1 %2626  ;;  %v2623_v15 = vpop.permute.xlu0 %2622 }
 0x445   : > { %v2628_v21 = vsel %vm4156_vm9, %v2623_v15, %v2625_v13  ;;  %v2629_v57 = vsel %vm4157_vm13, %v2625_v13, %v2627_v18 }
 0x446   : > { %3056 = vmatmul.mubr.msk.bf16.vlgmr.msra.gmra.mxu1 %vm4158_vm3, %v3175_v37  ;;  %2649 = vmatprep.subr.bf16.mxu0 %v2629_v57 }
 0x447   : > { %2650 = vmatpush1.bf16.msra.mxu0 %v2628_v21  ;;  %2735 = vmatpush1.bf16.msra.mxu1 %v2715_v20 }
 0x448   : > { %2752 = vmatprep.mubr.bf16.mxu1 %v3279_v1 }
 0x44a   : > { %3063 = vmatmul.mubr.msk.bf16.vlgmr.msra.gmra.mxu0 %vm4159_vm7, %v3176_v22 }
 0x44e   : > { %3068 = vmatmul.mubr.msk.bf16.vlgmr.msra.gmra.mxu1 %vm4160_vm12, %v3179_v28 }
 0x451   : > { %v2687_v14 = vpop.permute.xlu1 %2686 }
 0x4e5   : > { %v2019_v63 = vpop.f32.mrf.mxu0 }
 0x4e7   : > { %v2021_v23 = vpop.f32.mrf.mxu0 }
 0x4e9   : > { %v2023_v26 = vpop.f32.mrf.mxu0 }
 0x4ea   : > { %v2093_v24 = vpop.f32.mrf.mxu1 }
 0x4eb   : > { %v2025_v31 = vpop.f32.mrf.mxu0  ;;  %v2094_v34 = vadd.f32 %v2093_v24, %v2019_v63 }
 0x4ec   : > { %v2095_v29 = vpop.f32.mrf.mxu1 }
 0x4ed   : > { %v2096_v38 = vadd.f32 %v2095_v29, %v2021_v23 }
 0x4ee   : > { %v2097_v32 = vpop.f32.mrf.mxu1 }
 0x4ef   : > { %v2098_v43 = vadd.f32 %v2097_v32, %v2023_v26  ;;  %v2692_v26 = vpop.permute.xlu0 %2691 }
 0x4f0   : > { %v2099_v10 = vpop.f32.mrf.mxu1 }
 0x4f1   : > { %v2174_v3 = vpop.f32.mrf.mxu0  ;;  %v2100_v49 = vadd.f32 %v2099_v10, %v2025_v31 }
 0x4f2   : > { %v2183_v40 = vadd.f32 %v2174_v3, %v2094_v34 }
 0x4f3   : > { %v2176_v50 = vpop.f32.mrf.mxu0 }
 0x4f4   : > { %v2184_v44 = vadd.f32 %v2176_v50, %v2096_v38 }
 0x4f5   : > { %v2178_v59 = vpop.f32.mrf.mxu0 }
 0x4f6   : > { %v2259_v1 = vpop.f32.mrf.mxu1  ;;  %v2185_v51 = vadd.f32 %v2178_v59, %v2098_v43 }
 0x4f7   : > { %v2180_v25 = vpop.f32.mrf.mxu0  ;;  %v2268_v46 = vadd.f32 %v2259_v1, %v2183_v40 }
 0x4f8   : > { %v2261_v33 = vpop.f32.mrf.mxu1  ;;  %v2186_v55 = vadd.f32 %v2180_v25, %v2100_v49 }
 0x4f9   : > { %v2329_v35 = vpop.f32.mrf.mxu0  ;;  %v2269_v52 = vadd.f32 %v2261_v33, %v2184_v44 }
 0x4fa   : > { %v2263_v36 = vpop.f32.mrf.mxu1  ;;  %v2338_v56 = vadd.f32 %v2329_v35, %v2268_v46 }
 0x4fb   : > { %v2331_v41 = vpop.f32.mrf.mxu0  ;;  %v2270_v58 = vadd.f32 %v2263_v36, %v2185_v51 }
 0x4fc   : > { %v2265_v42 = vpop.f32.mrf.mxu1  ;;  %v2339_v2 = vadd.f32 %v2331_v41, %v2269_v52 }
 0x4fd   : > { %v2333_v47 = vpop.f32.mrf.mxu0  ;;  %v2271_v60 = vadd.f32 %v2265_v42, %v2186_v55 }
 0x4fe   : > { %v2418_v48 = vpop.f32.mrf.mxu1  ;;  %v2340_v7 = vadd.f32 %v2333_v47, %v2270_v58 }
 0x4ff   : > { %v2335_v53 = vpop.f32.mrf.mxu0  ;;  %v2427_v5 = vadd.f32 %v2418_v48, %v2338_v56 }
 0x500   : > { %v2420_v54 = vpop.f32.mrf.mxu1  ;;  %v2341_v0 = vadd.f32 %v2335_v53, %v2271_v60 }
 0x501   : > { %v2503_v61 = vpop.f32.mrf.mxu0  ;;  %v2428_v16 = vadd.f32 %v2420_v54, %v2339_v2 }
 0x502   : > { %v2422_v62 = vpop.f32.mrf.mxu1  ;;  %v2512_v4 = vadd.f32 %v2503_v61, %v2427_v5 }
 0x503   : > { %v2505_v6 = vpop.f32.mrf.mxu0  ;;  %v2429_v8 = vadd.f32 %v2422_v62, %v2340_v7 }
 0x504   : > { %v2424_v30 = vpop.f32.mrf.mxu1  ;;  %v2513_v27 = vadd.f32 %v2505_v6, %v2428_v16 }
 0x505   : > { %v2507_v17 = vpop.f32.mrf.mxu0  ;;  %v2430_v11 = vadd.f32 %v2424_v30, %v2341_v0 }
 0x506   : > { %v2584_v19 = vpop.f32.mrf.mxu1  ;;  %v2514_v37 = vadd.f32 %v2507_v17, %v2429_v8 }
 0x507   : > { %v2509_v9 = vpop.f32.mrf.mxu0  ;;  %v2593_v12 = vadd.f32 %v2584_v19, %v2512_v4 }
 0x508   : > { %v2586_v39 = vpop.f32.mrf.mxu1  ;;  %v2515_v57 = vadd.f32 %v2509_v9, %v2430_v11 }
 0x509   : > { %v2594_v18 = vadd.f32 %v2586_v39, %v2513_v27 }
 0x50a   : > { %v2588_v13 = vpop.f32.mrf.mxu1  ;;  %v2669_v45 = vpop.f32.mrf.mxu0 }
 0x50b   : > { %v2678_v15 = vadd.f32 %v2669_v45, %v2593_v12  ;;  %v2595_v22 = vadd.f32 %v2588_v13, %v2514_v37 }
 0x50c   : > { %v2590_v20 = vpop.f32.mrf.mxu1  ;;  %v2671_v21 = vpop.f32.mrf.mxu0 }
 0x50d   : > { %v2679_v28 = vadd.f32 %v2671_v21, %v2594_v18  ;;  %v2694_v63 = vadd.f32 %v2687_v14, %v2678_v15  ;;  %v2596_v29 = vadd.f32 %v2590_v20, %v2515_v57 }
 0x50e   : > { %v2673_v23 = vpop.f32.mrf.mxu0  ;;  %v2754_v24 = vpop.f32.mrf.mxu1 }
 0x50f   : > { %v2680_v31 = vadd.f32 %v2673_v23, %v2595_v22  ;;  %v2763_v32 = vadd.f32 %v2754_v24, %v2694_v63  ;;  %v2695_v3 = vadd.f32 %v2687_v14, %v2679_v28 }
 0x510   : > { %v2675_v50 = vpop.f32.mrf.mxu0  ;;  %v2756_v10 = vpop.f32.mrf.mxu1 }
 0x511   : > { %v2767_v59 = vmax.f32 %v2763_v32, 0.0  ;;  %v2681_v1 = vadd.f32 %v2675_v50, %v2596_v29  ;;  %v2764_v25 = vadd.f32 %v2756_v10, %v2695_v3  ;;  %v2696_v33 = vadd.f32 %v2692_v26, %v2680_v31 }
 0x512   : > { %v2758_v34 = vpop.f32.mrf.mxu1 }
 0x513   : > { %2771 = vst [vmem:[%s321_s10] sm:$0xff] %v2767_v59  ;;  %v2768_v35 = vmax.f32 %v2764_v25, 0.0  ;;  %v2765_v36 = vadd.f32 %v2758_v34, %v2696_v33  ;;  %v2697_v38 = vadd.f32 %v2692_v26, %v2681_v1 }
 0x514   : > { %v2760_v40 = vpop.f32.mrf.mxu1 }
 0x515   : > { %2772 = vst [vmem:[%s321_s10 + $0x8] sm:$0xff] %v2768_v35  ;;  %v2769_v41 = vmax.f32 %v2765_v36, 0.0  ;;  %v2766_v42 = vadd.f32 %v2760_v40, %v2697_v38 }
 0x517   : > { %2773 = vst [vmem:[%s321_s10 + $0x10] sm:$0xff] %v2769_v41  ;;  %v2770_v43 = vmax.f32 %v2766_v42, 0.0 }
 0x519   : > { %2774 = vst [vmem:[%s321_s10 + $0x18] sm:$0xff] %v2770_v43 }
 0x51a   : > { %3225 = shalt.err (!%p3222_p10)
}
 0x51b   : > { %s3226_s24 = scalar_lea.hbm %s4029_s15, 512  ;;  %s3230_s16 = scalar_lea.hbm %s4081_s8, 1024 }
 0x51c   : > { %p3227_p2 = scmp.ne.s32.totalorder %s4029_s15, %s3226_s24  ;;  %p3231_p7 = scmp.lt.s32.totalorder %s4029_s15, %s4081_s8 }
 0x51d   : > { %p3232_p0 = scmp.lt.s32.totalorder %s3230_s16, %s3226_s24 }
 0x51e   : > { %p3228_p4 = pnand %p3227_p2, %p4161_p12 }
 0x51f   : > { %p3233_p6 = por %p3232_p0, %p3231_p7 }
 0x520   : > { %p3229_p9 = pneg %p3228_p4 }
 0x522   : > { %p3234_p11 = pnand %p3233_p6, %p3229_p9 }
 0x524   : > { %3237 = shalt.err (!%p3234_p11)
}
 0x525   : > { %s3289_s25 = smov 256  }
 0x526   : > { %3082 = dma.vmem_to_hbm [thread:$0]  (%p4161_p12), %s4024_s12, 512, %s4029_s15, %s2776_s19, %s3289_s25, %s3289_s25, %s3286_s23  }
 0x527 PF: > { %s2804_s9 = sand.u32 1, %s3264_s27   ;;  %p4162_p13 = scmp.ne.s32.totalorder %s4097_s18, 0 }
 0x528   : > { %p4163_p1 = scmp.ge.s32.totalorder %s3276_s30, 2  ;;  %s2805_s14 = scalar_lea.sflag [#allocation6], %s2804_s9 }
 0x52a   : > { %p3089_p3 = pnand %p4163_p1, %p4162_p13 }
 0x52c   : > { %p3090_p5 = pneg %p3089_p3 }
 0x52e   : > { %3259 = dma.done.wait (%p3090_p5), %s2805_s14, 512  }
 0x52f   : > { %3261 = vsyncadd (%p3090_p5), %s2805_s14, 4294966784  ;;  %s4164_s17 = sld [smem:[#allocation10_spill]]  ;;  %p21_p8 = scmp.ge.s32.totalorder %s3360_s11, 4  }
 0x530   : > { %s4165_s27 = smov %s3268_s28  ;;  %s4166_s28 = smov %s3272_s29 }
 0x531   : > { %s4168_s30 = smov %s3360_s11  ;;  %23 = sbr.rel (!%p21_p8) target bundleno = 5 (0x5), region = 121 }
 0x535   : > { %s4167_s29 = smov %s4164_s17 }
 0x536   :  { %2810 = vsyncpa [#allocation5], 1 }
 0x537   :  { %2812 = vsyncpa [#allocation5 + $0x1], 1 }
 0x538   :  { %2813 = vsyncpa [#allocation6], 1 }
 0x539   :  { %2815 = vsyncpa [#allocation6 + $0x1], 1 }

</bundles_post_ra>
